<compile_context>
chip_gen: v7x
topology: tpu7x:2x2x1
jax: 0.10.0
libtpu: 0.0.40
codegen_flags: <defaults>
</compile_context>

<pallas_src>
import functools
import math

import jax
import jax.numpy as jnp
from jax.experimental import pallas as pl
from jax.experimental.pallas import tpu as pltpu

# ---------------- small, self-consistent configuration -----------------
PATCH = (4, 4)          # patch size
IMG = (16, 16)          # image size
C_IN = 3                # input channels
EMBED = 32              # embedding dim
NUM_LAYERS = 2          # transformer blocks
NUM_HEADS = 4           # attention heads
DIM_FF = 64             # MLP hidden dim
MASK_RATIO = 0.75
LN_EPS = 1e-5

N_PATCHES = (IMG[0] // PATCH[0]) * (IMG[1] // PATCH[1])   # 16
PATCH_DIM = C_IN * PATCH[0] * PATCH[1]                    # 48
LEN_KEEP = int(N_PATCHES * (1 - MASK_RATIO))              # 4
SEQ = 1 + LEN_KEEP                                        # 5 (cls + kept)


# =========================== fused Pallas kernel ============================

def _layernorm(x, w, b):
    mu = jnp.mean(x, axis=-1, keepdims=True)
    var = jnp.mean((x - mu) ** 2, axis=-1, keepdims=True)
    return (x - mu) * jax.lax.rsqrt(var + LN_EPS) * w + b


def _encoder_kernel(patches_ref, pos_kept_ref, pw_ref, pb_ref, cls_ref, pos0_ref,
                    ln1w_ref, ln1b_ref, wqkv_ref, bqkv_ref, wo_ref, bo_ref,
                    ln2w_ref, ln2b_ref, w1_ref, b1_ref, w2_ref, b2_ref,
                    normw_ref, normb_ref, o_ref,
                    *, batch, len_keep, num_heads, num_layers):
    D = pw_ref.shape[1]
    hd = D // num_heads
    seq = 1 + len_keep
    scale = 1.0 / math.sqrt(hd)
    f32 = jnp.float32

    # ---- patch embedding (conv-as-matmul) + positional embeddings ----
    # kept-patch tokens: PatchEmbed(patch) + pos_embed[1 + orig_idx] + pos_embed[0]
    tok = (jnp.dot(patches_ref[...], pw_ref[...], preferred_element_type=f32)
           + pb_ref[...] + pos_kept_ref[...] + pos0_ref[...])          # (B*K, D)
    # cls token: cls + pos_embed[0]  (reference broadcasts pos_embed[:, :1]
    # over every token after the concat, hence the + pos0 on both paths).
    cls_row = cls_ref[...] + pos0_ref[...]                             # (1, D)

    # ---- assemble the (B*S, D) token matrix: [cls, kept patches] per image ----
    pieces = []
    for b in range(batch):
        pieces.append(cls_row)
        pieces.append(tok[b * len_keep:(b + 1) * len_keep])
    h = jnp.concatenate(pieces, axis=0)                                # (B*S, D)

    # ---- transformer blocks (unrolled; all weights stay resident in VMEM) ----
    for l in range(num_layers):
        # -- multi-head self-attention (pre-norm), batch folded into M --
        y = _layernorm(h, ln1w_ref[l], ln1b_ref[l])
        qkv = (jnp.dot(y, wqkv_ref[l], preferred_element_type=f32)
               + bqkv_ref[l])                                          # (B*S, 3D)
        attn_rows = []
        for b in range(batch):
            qkv_b = qkv[b * seq:(b + 1) * seq]                         # (S, 3D)
            qh = jnp.stack([qkv_b[:, hh * hd:(hh + 1) * hd]
                            for hh in range(num_heads)], axis=0)       # (H, S, hd)
            kh = jnp.stack([qkv_b[:, D + hh * hd:D + (hh + 1) * hd]
                            for hh in range(num_heads)], axis=0)
            vh = jnp.stack([qkv_b[:, 2 * D + hh * hd:2 * D + (hh + 1) * hd]
                            for hh in range(num_heads)], axis=0)
            # heads-batched score / softmax / PV (single einsums, one softmax)
            s = jnp.einsum("hqd,hkd->hqk", qh, kh,
                           preferred_element_type=f32) * scale         # (H, S, S)
            s = s - jnp.max(s, axis=-1, keepdims=True)
            p = jnp.exp(s)
            p = p / jnp.sum(p, axis=-1, keepdims=True)
            o = jnp.einsum("hqk,hkd->hqd", p, vh,
                           preferred_element_type=f32)                 # (H, S, hd)
            attn_rows.append(jnp.concatenate(
                [o[hh] for hh in range(num_heads)], axis=-1))          # (S, D)
        attn = jnp.concatenate(attn_rows, axis=0)                      # (B*S, D)
        attn = (jnp.dot(attn, wo_ref[l], preferred_element_type=f32)
                + bo_ref[l])
        h = h + attn

        # -- MLP (pre-norm), batch folded into M --
        z = _layernorm(h, ln2w_ref[l], ln2b_ref[l])
        h1 = jnp.dot(z, w1_ref[l], preferred_element_type=f32) + b1_ref[l]
        # TODO(synk): approximate=False (exact erf) if PyTorch block uses nn.GELU().
        h1 = jax.nn.gelu(h1, approximate=True)
        h2 = jnp.dot(h1, w2_ref[l], preferred_element_type=f32) + b2_ref[l]
        h = h + h2

    # ---- final LayerNorm, written as one (B*S, D) slab ----
    o_ref[...] = _layernorm(h, normw_ref[...], normb_ref[...])


def _full_spec(a):
    nd = a.ndim
    return pl.BlockSpec(a.shape, lambda i, _nd=nd: (0,) * _nd)


def encoder_pallas(params, patches_kept, pos_kept, *, batch, len_keep):
    """Single fused pallas_call: patch embed + all blocks + final LN."""
    seq = 1 + len_keep
    bs = batch * seq
    blk = params["blocks"]
    inputs = [
        patches_kept,                              # (B*K, PATCH_DIM)
        pos_kept,                                  # (B*K, D)
        params["patch_w"], params["patch_b"],      # (P, D), (1, D)
        params["cls_token"].reshape(1, EMBED),     # (1, D)
        params["pos_embed"][0, 0:1, :],            # (1, D)  pos_embed[:, :1]
        blk["ln1_w"], blk["ln1_b"], blk["wqkv"], blk["bqkv"],
        blk["wo"], blk["bo"], blk["ln2_w"], blk["ln2_b"],
        blk["w1"], blk["b1"], blk["w2"], blk["b2"],
        params["norm_w"], params["norm_b"],
    ]
    kernel = functools.partial(_encoder_kernel, batch=batch, len_keep=len_keep,
                               num_heads=NUM_HEADS, num_layers=NUM_LAYERS)
    out = pl.pallas_call(
        kernel,
        out_shape=jax.ShapeDtypeStruct((bs, EMBED), jnp.float32),
        grid=(1,),
        in_specs=[_full_spec(a) for a in inputs],
        out_specs=pl.BlockSpec((bs, EMBED), lambda i: (0, 0)),
        compiler_params=pltpu.CompilerParams(
            dimension_semantics=("arbitrary",)),
    )(*inputs)
    return out.reshape(batch, seq, EMBED)


# ======================= parameter initialization ======================

def xavier_uniform(key, shape, fan_in, fan_out):
    limit = math.sqrt(6.0 / (fan_in + fan_out))
    return jax.random.uniform(key, shape, jnp.float32, -limit, limit)


def init_params(key):
    keys = jax.random.split(key, 3 + NUM_LAYERS)
    params = {}
    # patch embedding: Conv2d(C_IN, EMBED, PATCH, stride=PATCH) as a matmul,
    # weight stored already transposed: (PATCH_DIM, EMBED)
    params["patch_w"] = xavier_uniform(keys[0], (PATCH_DIM, EMBED),
                                       PATCH_DIM, EMBED)
    params["patch_b"] = jnp.zeros((1, EMBED), jnp.float32)
    params["cls_token"] = 0.02 * jax.random.normal(keys[1], (1, 1, EMBED),
                                                   jnp.float32)
    params["pos_embed"] = 0.02 * jax.random.normal(
        keys[2], (1, 1 + N_PATCHES, EMBED), jnp.float32)
    params["norm_w"] = jnp.ones((1, EMBED), jnp.float32)
    params["norm_b"] = jnp.zeros((1, EMBED), jnp.float32)

    # per-layer weights, stacked along a leading layer axis
    wqkv, wo, w1, w2 = [], [], [], []
    for l in range(NUM_LAYERS):
        bkeys = jax.random.split(keys[3 + l], 4)
        wqkv.append(xavier_uniform(bkeys[0], (EMBED, 3 * EMBED),
                                   EMBED, 3 * EMBED))
        wo.append(xavier_uniform(bkeys[1], (EMBED, EMBED), EMBED, EMBED))
        w1.append(xavier_uniform(bkeys[2], (EMBED, DIM_FF), EMBED, DIM_FF))
        w2.append(xavier_uniform(bkeys[3], (DIM_FF, EMBED), DIM_FF, EMBED))
    L = NUM_LAYERS
    params["blocks"] = {
        "ln1_w": jnp.ones((L, 1, EMBED), jnp.float32),
        "ln1_b": jnp.zeros((L, 1, EMBED), jnp.float32),
        "wqkv": jnp.stack(wqkv),
        "bqkv": jnp.zeros((L, 1, 3 * EMBED), jnp.float32),
        "wo": jnp.stack(wo),
        "bo": jnp.zeros((L, 1, EMBED), jnp.float32),
        "ln2_w": jnp.ones((L, 1, EMBED), jnp.float32),
        "ln2_b": jnp.zeros((L, 1, EMBED), jnp.float32),
        "w1": jnp.stack(w1),
        "b1": jnp.zeros((L, 1, DIM_FF), jnp.float32),
        "w2": jnp.stack(w2),
        "b2": jnp.zeros((L, 1, EMBED), jnp.float32),
    }
    return params


# ============================== forward ================================

def extract_patches(x):
    """(B, C, H, W) -> (B, N, C*ph*pw) with (C, ph, pw) flattening order."""
    B, C, H, W = x.shape
    ph, pw = PATCH
    gh, gw = H // ph, W // pw
    x = x.reshape(B, C, gh, ph, gw, pw)
    x = x.transpose(0, 2, 4, 1, 3, 5)          # (B, gh, gw, C, ph, pw)
    return x.reshape(B, gh * gw, C * ph * pw)


def vit_encoder_forward(params, x, mask_key):
    B = x.shape[0]
    patches = extract_patches(x)                                  # (B, N, P)

    # ---- random masking (RNG + argsort glue: plain JAX) ----
    noise = jax.random.uniform(mask_key, (B, N_PATCHES))
    ids_shuffle = jnp.argsort(noise, axis=1)
    ids_restore = jnp.argsort(ids_shuffle, axis=1)
    ids_keep = ids_shuffle[:, :LEN_KEEP]
    mask = jnp.ones((B, N_PATCHES), jnp.float32)
    mask = mask.at[:, :LEN_KEEP].set(0.0)
    mask = jnp.take_along_axis(mask, ids_restore, axis=1)

    # The per-patch gather commutes with the (linear, per-patch) patch
    # embedding and positional add, so it is hoisted in front of the kernel:
    #   gather(patch_embed(p) + pos) == patch_embed(gather(p)) + gather(pos)
    patches_kept = jnp.take_along_axis(patches, ids_keep[:, :, None], axis=1)
    pos_kept = params["pos_embed"][0, 1:][ids_keep]               # (B, K, D)

    h = encoder_pallas(
        params,
        patches_kept.reshape(B * LEN_KEEP, PATCH_DIM),
        pos_kept.reshape(B * LEN_KEEP, EMBED),
        batch=B, len_keep=LEN_KEEP)
    return h, mask, ids_restore


# =============================== main ==================================

if __name__ == "__main__":
    root = jax.random.PRNGKey(0)
    k_params, k_input, k_mask = jax.random.split(root, 3)

    params = init_params(k_params)
    x = jax.random.normal(k_input, (2, C_IN, IMG[0], IMG[1]), jnp.float32)

    fwd = jax.jit(vit_encoder_forward)
    out, mask, ids_restore = fwd(params, x, k_mask)
    out = jax.block_until_ready(out)
    mask = jax.block_until_ready(mask)
    ids_restore = jax.block_until_ready(ids_restore)

    assert out.shape == (2, SEQ, EMBED)
    assert mask.shape == (2, N_PATCHES)
    assert ids_restore.shape == (2, N_PATCHES)
    assert bool(jnp.all(jnp.isfinite(out)))

    print("KERNEL_OK")
</pallas_src>

<mosaic_0001>
module attributes {stable_mosaic.version = 11 : i64} {
  func.func @_encoder_kernel(%arg0: i32, %arg1: memref<8x48xf32, #tpu.memory_space<vmem>>, %arg2: memref<8x32xf32, #tpu.memory_space<vmem>>, %arg3: memref<48x32xf32, #tpu.memory_space<vmem>>, %arg4: memref<1x32xf32, #tpu.memory_space<vmem>>, %arg5: memref<1x32xf32, #tpu.memory_space<vmem>>, %arg6: memref<1x32xf32, #tpu.memory_space<vmem>>, %arg7: memref<2x1x32xf32, #tpu.memory_space<vmem>>, %arg8: memref<2x1x32xf32, #tpu.memory_space<vmem>>, %arg9: memref<2x32x96xf32, #tpu.memory_space<vmem>>, %arg10: memref<2x1x96xf32, #tpu.memory_space<vmem>>, %arg11: memref<2x32x32xf32, #tpu.memory_space<vmem>>, %arg12: memref<2x1x32xf32, #tpu.memory_space<vmem>>, %arg13: memref<2x1x32xf32, #tpu.memory_space<vmem>>, %arg14: memref<2x1x32xf32, #tpu.memory_space<vmem>>, %arg15: memref<2x32x64xf32, #tpu.memory_space<vmem>>, %arg16: memref<2x1x64xf32, #tpu.memory_space<vmem>>, %arg17: memref<2x64x32xf32, #tpu.memory_space<vmem>>, %arg18: memref<2x1x32xf32, #tpu.memory_space<vmem>>, %arg19: memref<1x32xf32, #tpu.memory_space<vmem>>, %arg20: memref<1x32xf32, #tpu.memory_space<vmem>>, %arg21: memref<10x32xf32, #tpu.memory_space<vmem>>) attributes {dimension_semantics = [#tpu.dimension_semantics<arbitrary>], iteration_bounds = array<i64: 1>, scalar_prefetch = 0 : i64, scratch_operands = 0 : i64, tpu.core_type = #tpu.core_type<tc>, window_params = [{pipeline_mode = #tpu.pipeline_mode<synchronous>, transform_indices = @transform_0, window_bounds = array<i64: 8, 48>}, {pipeline_mode = #tpu.pipeline_mode<synchronous>, transform_indices = @transform_1, window_bounds = array<i64: 8, 32>}, {pipeline_mode = #tpu.pipeline_mode<synchronous>, transform_indices = @transform_2, window_bounds = array<i64: 48, 32>}, {pipeline_mode = #tpu.pipeline_mode<synchronous>, transform_indices = @transform_3, window_bounds = array<i64: 1, 32>}, {pipeline_mode = #tpu.pipeline_mode<synchronous>, transform_indices = @transform_4, window_bounds = array<i64: 1, 32>}, {pipeline_mode = #tpu.pipeline_mode<synchronous>, transform_indices = @transform_5, window_bounds = array<i64: 1, 32>}, {pipeline_mode = #tpu.pipeline_mode<synchronous>, transform_indices = @transform_6, window_bounds = array<i64: 2, 1, 32>}, {pipeline_mode = #tpu.pipeline_mode<synchronous>, transform_indices = @transform_7, window_bounds = array<i64: 2, 1, 32>}, {pipeline_mode = #tpu.pipeline_mode<synchronous>, transform_indices = @transform_8, window_bounds = array<i64: 2, 32, 96>}, {pipeline_mode = #tpu.pipeline_mode<synchronous>, transform_indices = @transform_9, window_bounds = array<i64: 2, 1, 96>}, {pipeline_mode = #tpu.pipeline_mode<synchronous>, transform_indices = @transform_10, window_bounds = array<i64: 2, 32, 32>}, {pipeline_mode = #tpu.pipeline_mode<synchronous>, transform_indices = @transform_11, window_bounds = array<i64: 2, 1, 32>}, {pipeline_mode = #tpu.pipeline_mode<synchronous>, transform_indices = @transform_12, window_bounds = array<i64: 2, 1, 32>}, {pipeline_mode = #tpu.pipeline_mode<synchronous>, transform_indices = @transform_13, window_bounds = array<i64: 2, 1, 32>}, {pipeline_mode = #tpu.pipeline_mode<synchronous>, transform_indices = @transform_14, window_bounds = array<i64: 2, 32, 64>}, {pipeline_mode = #tpu.pipeline_mode<synchronous>, transform_indices = @transform_15, window_bounds = array<i64: 2, 1, 64>}, {pipeline_mode = #tpu.pipeline_mode<synchronous>, transform_indices = @transform_16, window_bounds = array<i64: 2, 64, 32>}, {pipeline_mode = #tpu.pipeline_mode<synchronous>, transform_indices = @transform_17, window_bounds = array<i64: 2, 1, 32>}, {pipeline_mode = #tpu.pipeline_mode<synchronous>, transform_indices = @transform_18, window_bounds = array<i64: 1, 32>}, {pipeline_mode = #tpu.pipeline_mode<synchronous>, transform_indices = @transform_19, window_bounds = array<i64: 1, 32>}, {pipeline_mode = #tpu.pipeline_mode<synchronous>, transform_indices = @transform_20, window_bounds = array<i64: 10, 32>}]} {
    %c0 = arith.constant 0 : index
    %c0_0 = arith.constant 0 : index
    %0 = vector.load %arg1[%c0, %c0_0] : memref<8x48xf32, #tpu.memory_space<vmem>>, vector<8x48xf32>
    %c0_1 = arith.constant 0 : index
    %c0_2 = arith.constant 0 : index
    %1 = vector.load %arg3[%c0_1, %c0_2] : memref<48x32xf32, #tpu.memory_space<vmem>>, vector<48x32xf32>
    %cst = arith.constant dense<0.000000e+00> : vector<8x32xf32>
    %2 = tpu.matmul %0, %1, %cst {dimension_numbers = #tpu.dot_dimension_numbers<[1], [0], [0], [1], [0, 0, 1, 1], [], []>} : vector<8x48xf32>, vector<48x32xf32>, vector<8x32xf32> -> vector<8x32xf32>
    %c0_3 = arith.constant 0 : index
    %c0_4 = arith.constant 0 : index
    %3 = vector.load %arg4[%c0_3, %c0_4] : memref<1x32xf32, #tpu.memory_space<vmem>>, vector<1x32xf32>
    %4 = vector.broadcast %3 : vector<1x32xf32> to vector<8x32xf32>
    %5 = arith.addf %2, %4 : vector<8x32xf32>
    %c0_5 = arith.constant 0 : index
    %c0_6 = arith.constant 0 : index
    %6 = vector.load %arg2[%c0_5, %c0_6] : memref<8x32xf32, #tpu.memory_space<vmem>>, vector<8x32xf32>
    %7 = arith.addf %5, %6 : vector<8x32xf32>
    %c0_7 = arith.constant 0 : index
    %c0_8 = arith.constant 0 : index
    %8 = vector.load %arg6[%c0_7, %c0_8] : memref<1x32xf32, #tpu.memory_space<vmem>>, vector<1x32xf32>
    %9 = vector.broadcast %8 : vector<1x32xf32> to vector<8x32xf32>
    %10 = arith.addf %7, %9 : vector<8x32xf32>
    %c0_9 = arith.constant 0 : index
    %c0_10 = arith.constant 0 : index
    %11 = vector.load %arg5[%c0_9, %c0_10] : memref<1x32xf32, #tpu.memory_space<vmem>>, vector<1x32xf32>
    %c0_11 = arith.constant 0 : index
    %c0_12 = arith.constant 0 : index
    %12 = vector.load %arg6[%c0_11, %c0_12] : memref<1x32xf32, #tpu.memory_space<vmem>>, vector<1x32xf32>
    %13 = arith.addf %11, %12 : vector<1x32xf32>
    %14 = vector.extract_strided_slice %10 {offsets = [0, 0], sizes = [4, 32], strides = [1, 1]} : vector<8x32xf32> to vector<4x32xf32>
    %15 = vector.extract_strided_slice %10 {offsets = [4, 0], sizes = [4, 32], strides = [1, 1]} : vector<8x32xf32> to vector<4x32xf32>
    %16 = tpu.concatenate %13, %14, %13, %15 in 0 : vector<1x32xf32>, vector<4x32xf32>, vector<1x32xf32>, vector<4x32xf32> -> vector<10x32xf32>
    %c0_13 = arith.constant 0 : index
    %c0_14 = arith.constant 0 : index
    %c0_15 = arith.constant 0 : index
    %17 = vector.load %arg7[%c0_13, %c0_14, %c0_15] : memref<2x1x32xf32, #tpu.memory_space<vmem>>, vector<1x1x32xf32>
    %18 = vector.shape_cast %17 : vector<1x1x32xf32> to vector<1x32xf32>
    %c0_16 = arith.constant 0 : index
    %c0_17 = arith.constant 0 : index
    %c0_18 = arith.constant 0 : index
    %19 = vector.load %arg8[%c0_16, %c0_17, %c0_18] : memref<2x1x32xf32, #tpu.memory_space<vmem>>, vector<1x1x32xf32>
    %20 = vector.shape_cast %19 : vector<1x1x32xf32> to vector<1x32xf32>
    %cst_19 = arith.constant dense<0.000000e+00> : vector<10xf32>
    %21 = vector.multi_reduction <add>, %16, %cst_19 [1] : vector<10x32xf32> to vector<10xf32>
    %22 = vector.shape_cast %21 : vector<10xf32> to vector<10x1xf32>
    %cst_20 = arith.constant 3.200000e+01 : f32
    %23 = vector.broadcast %cst_20 : f32 to vector<10x1xf32>
    %24 = arith.divf %22, %23 : vector<10x1xf32>
    %25 = vector.broadcast %24 : vector<10x1xf32> to vector<10x32xf32>
    %26 = arith.subf %16, %25 : vector<10x32xf32>
    %27 = arith.mulf %26, %26 : vector<10x32xf32>
    %cst_21 = arith.constant dense<0.000000e+00> : vector<10xf32>
    %28 = vector.multi_reduction <add>, %27, %cst_21 [1] : vector<10x32xf32> to vector<10xf32>
    %29 = vector.shape_cast %28 : vector<10xf32> to vector<10x1xf32>
    %cst_22 = arith.constant 3.200000e+01 : f32
    %30 = vector.broadcast %cst_22 : f32 to vector<10x1xf32>
    %31 = arith.divf %29, %30 : vector<10x1xf32>
    %32 = vector.broadcast %24 : vector<10x1xf32> to vector<10x32xf32>
    %33 = arith.subf %16, %32 : vector<10x32xf32>
    %cst_23 = arith.constant 9.99999974E-6 : f32
    %34 = vector.broadcast %cst_23 : f32 to vector<10x1xf32>
    %35 = arith.addf %31, %34 : vector<10x1xf32>
    %36 = math.rsqrt %35 : vector<10x1xf32>
    %37 = vector.broadcast %36 : vector<10x1xf32> to vector<10x32xf32>
    %38 = arith.mulf %33, %37 : vector<10x32xf32>
    %39 = vector.broadcast %18 : vector<1x32xf32> to vector<10x32xf32>
    %40 = arith.mulf %38, %39 : vector<10x32xf32>
    %41 = vector.broadcast %20 : vector<1x32xf32> to vector<10x32xf32>
    %42 = arith.addf %40, %41 : vector<10x32xf32>
    %c0_24 = arith.constant 0 : index
    %c0_25 = arith.constant 0 : index
    %c0_26 = arith.constant 0 : index
    %43 = vector.load %arg9[%c0_24, %c0_25, %c0_26] : memref<2x32x96xf32, #tpu.memory_space<vmem>>, vector<1x32x96xf32>
    %44 = vector.shape_cast %43 : vector<1x32x96xf32> to vector<32x96xf32>
    %cst_27 = arith.constant dense<0.000000e+00> : vector<10x96xf32>
    %45 = tpu.matmul %42, %44, %cst_27 {dimension_numbers = #tpu.dot_dimension_numbers<[1], [0], [0], [1], [0, 0, 1, 1], [], []>} : vector<10x32xf32>, vector<32x96xf32>, vector<10x96xf32> -> vector<10x96xf32>
    %c0_28 = arith.constant 0 : index
    %c0_29 = arith.constant 0 : index
    %c0_30 = arith.constant 0 : index
    %46 = vector.load %arg10[%c0_28, %c0_29, %c0_30] : memref<2x1x96xf32, #tpu.memory_space<vmem>>, vector<1x1x96xf32>
    %47 = vector.shape_cast %46 : vector<1x1x96xf32> to vector<1x96xf32>
    %48 = vector.broadcast %47 : vector<1x96xf32> to vector<10x96xf32>
    %49 = arith.addf %45, %48 : vector<10x96xf32>
    %50 = vector.extract_strided_slice %49 {offsets = [0, 0], sizes = [5, 96], strides = [1, 1]} : vector<10x96xf32> to vector<5x96xf32>
    %51 = vector.extract_strided_slice %50 {offsets = [0, 0], sizes = [5, 8], strides = [1, 1]} : vector<5x96xf32> to vector<5x8xf32>
    %52 = vector.extract_strided_slice %50 {offsets = [0, 8], sizes = [5, 8], strides = [1, 1]} : vector<5x96xf32> to vector<5x8xf32>
    %53 = vector.extract_strided_slice %50 {offsets = [0, 16], sizes = [5, 8], strides = [1, 1]} : vector<5x96xf32> to vector<5x8xf32>
    %54 = vector.extract_strided_slice %50 {offsets = [0, 24], sizes = [5, 8], strides = [1, 1]} : vector<5x96xf32> to vector<5x8xf32>
    %55 = vector.shape_cast %51 : vector<5x8xf32> to vector<1x5x8xf32>
    %56 = vector.shape_cast %52 : vector<5x8xf32> to vector<1x5x8xf32>
    %57 = vector.shape_cast %53 : vector<5x8xf32> to vector<1x5x8xf32>
    %58 = vector.shape_cast %54 : vector<5x8xf32> to vector<1x5x8xf32>
    %59 = tpu.concatenate %55, %56, %57, %58 in 0 : vector<1x5x8xf32>, vector<1x5x8xf32>, vector<1x5x8xf32>, vector<1x5x8xf32> -> vector<4x5x8xf32>
    %60 = vector.extract_strided_slice %50 {offsets = [0, 32], sizes = [5, 8], strides = [1, 1]} : vector<5x96xf32> to vector<5x8xf32>
    %61 = vector.extract_strided_slice %50 {offsets = [0, 40], sizes = [5, 8], strides = [1, 1]} : vector<5x96xf32> to vector<5x8xf32>
    %62 = vector.extract_strided_slice %50 {offsets = [0, 48], sizes = [5, 8], strides = [1, 1]} : vector<5x96xf32> to vector<5x8xf32>
    %63 = vector.extract_strided_slice %50 {offsets = [0, 56], sizes = [5, 8], strides = [1, 1]} : vector<5x96xf32> to vector<5x8xf32>
    %64 = vector.shape_cast %60 : vector<5x8xf32> to vector<1x5x8xf32>
    %65 = vector.shape_cast %61 : vector<5x8xf32> to vector<1x5x8xf32>
    %66 = vector.shape_cast %62 : vector<5x8xf32> to vector<1x5x8xf32>
    %67 = vector.shape_cast %63 : vector<5x8xf32> to vector<1x5x8xf32>
    %68 = tpu.concatenate %64, %65, %66, %67 in 0 : vector<1x5x8xf32>, vector<1x5x8xf32>, vector<1x5x8xf32>, vector<1x5x8xf32> -> vector<4x5x8xf32>
    %69 = vector.extract_strided_slice %50 {offsets = [0, 64], sizes = [5, 8], strides = [1, 1]} : vector<5x96xf32> to vector<5x8xf32>
    %70 = vector.extract_strided_slice %50 {offsets = [0, 72], sizes = [5, 8], strides = [1, 1]} : vector<5x96xf32> to vector<5x8xf32>
    %71 = vector.extract_strided_slice %50 {offsets = [0, 80], sizes = [5, 8], strides = [1, 1]} : vector<5x96xf32> to vector<5x8xf32>
    %72 = vector.extract_strided_slice %50 {offsets = [0, 88], sizes = [5, 8], strides = [1, 1]} : vector<5x96xf32> to vector<5x8xf32>
    %73 = vector.shape_cast %69 : vector<5x8xf32> to vector<1x5x8xf32>
    %74 = vector.shape_cast %70 : vector<5x8xf32> to vector<1x5x8xf32>
    %75 = vector.shape_cast %71 : vector<5x8xf32> to vector<1x5x8xf32>
    %76 = vector.shape_cast %72 : vector<5x8xf32> to vector<1x5x8xf32>
    %77 = tpu.concatenate %73, %74, %75, %76 in 0 : vector<1x5x8xf32>, vector<1x5x8xf32>, vector<1x5x8xf32>, vector<1x5x8xf32> -> vector<4x5x8xf32>
    "tpu.trace_start"() <{level = 10 : i32, message = "hqd,hkd->hqk"}> : () -> ()
    %cst_31 = arith.constant dense<0.000000e+00> : vector<4x5x5xf32>
    %78 = tpu.matmul %59, %68, %cst_31 {dimension_numbers = #tpu.dot_dimension_numbers<[2], [2], [1], [1], [0, 0, 0, 1, 1, 1], [0], [0]>} : vector<4x5x8xf32>, vector<4x5x8xf32>, vector<4x5x5xf32> -> vector<4x5x5xf32>
    "tpu.trace_stop"() : () -> ()
    %cst_32 = arith.constant 0.353553385 : f32
    %79 = vector.broadcast %cst_32 : f32 to vector<4x5x5xf32>
    %80 = arith.mulf %78, %79 : vector<4x5x5xf32>
    %cst_33 = arith.constant dense<0xFF800000> : vector<4x5xf32>
    %81 = vector.multi_reduction <maximumf>, %80, %cst_33 [2] : vector<4x5x5xf32> to vector<4x5xf32>
    %82 = vector.shape_cast %81 : vector<4x5xf32> to vector<4x5x1xf32>
    %83 = vector.broadcast %82 : vector<4x5x1xf32> to vector<4x5x5xf32>
    %84 = arith.subf %80, %83 : vector<4x5x5xf32>
    %85 = math.exp %84 : vector<4x5x5xf32>
    %cst_34 = arith.constant dense<0.000000e+00> : vector<4x5xf32>
    %86 = vector.multi_reduction <add>, %85, %cst_34 [2] : vector<4x5x5xf32> to vector<4x5xf32>
    %87 = vector.shape_cast %86 : vector<4x5xf32> to vector<4x5x1xf32>
    %88 = vector.broadcast %87 : vector<4x5x1xf32> to vector<4x5x5xf32>
    %89 = arith.divf %85, %88 : vector<4x5x5xf32>
    "tpu.trace_start"() <{level = 10 : i32, message = "hqk,hkd->hqd"}> : () -> ()
    %cst_35 = arith.constant dense<0.000000e+00> : vector<4x5x8xf32>
    %90 = tpu.matmul %89, %77, %cst_35 {dimension_numbers = #tpu.dot_dimension_numbers<[2], [1], [1], [2], [0, 0, 0, 1, 1, 2], [0], [0]>} : vector<4x5x5xf32>, vector<4x5x8xf32>, vector<4x5x8xf32> -> vector<4x5x8xf32>
    "tpu.trace_stop"() : () -> ()
    %91 = vector.extract_strided_slice %90 {offsets = [0, 0, 0], sizes = [1, 5, 8], strides = [1, 1, 1]} : vector<4x5x8xf32> to vector<1x5x8xf32>
    %92 = vector.shape_cast %91 : vector<1x5x8xf32> to vector<5x8xf32>
    %93 = vector.extract_strided_slice %90 {offsets = [1, 0, 0], sizes = [1, 5, 8], strides = [1, 1, 1]} : vector<4x5x8xf32> to vector<1x5x8xf32>
    %94 = vector.shape_cast %93 : vector<1x5x8xf32> to vector<5x8xf32>
    %95 = vector.extract_strided_slice %90 {offsets = [2, 0, 0], sizes = [1, 5, 8], strides = [1, 1, 1]} : vector<4x5x8xf32> to vector<1x5x8xf32>
    %96 = vector.shape_cast %95 : vector<1x5x8xf32> to vector<5x8xf32>
    %97 = vector.extract_strided_slice %90 {offsets = [3, 0, 0], sizes = [1, 5, 8], strides = [1, 1, 1]} : vector<4x5x8xf32> to vector<1x5x8xf32>
    %98 = vector.shape_cast %97 : vector<1x5x8xf32> to vector<5x8xf32>
    %99 = tpu.concatenate %92, %94, %96, %98 in 1 : vector<5x8xf32>, vector<5x8xf32>, vector<5x8xf32>, vector<5x8xf32> -> vector<5x32xf32>
    %100 = vector.extract_strided_slice %49 {offsets = [5, 0], sizes = [5, 96], strides = [1, 1]} : vector<10x96xf32> to vector<5x96xf32>
    %101 = vector.extract_strided_slice %100 {offsets = [0, 0], sizes = [5, 8], strides = [1, 1]} : vector<5x96xf32> to vector<5x8xf32>
    %102 = vector.extract_strided_slice %100 {offsets = [0, 8], sizes = [5, 8], strides = [1, 1]} : vector<5x96xf32> to vector<5x8xf32>
    %103 = vector.extract_strided_slice %100 {offsets = [0, 16], sizes = [5, 8], strides = [1, 1]} : vector<5x96xf32> to vector<5x8xf32>
    %104 = vector.extract_strided_slice %100 {offsets = [0, 24], sizes = [5, 8], strides = [1, 1]} : vector<5x96xf32> to vector<5x8xf32>
    %105 = vector.shape_cast %101 : vector<5x8xf32> to vector<1x5x8xf32>
    %106 = vector.shape_cast %102 : vector<5x8xf32> to vector<1x5x8xf32>
    %107 = vector.shape_cast %103 : vector<5x8xf32> to vector<1x5x8xf32>
    %108 = vector.shape_cast %104 : vector<5x8xf32> to vector<1x5x8xf32>
    %109 = tpu.concatenate %105, %106, %107, %108 in 0 : vector<1x5x8xf32>, vector<1x5x8xf32>, vector<1x5x8xf32>, vector<1x5x8xf32> -> vector<4x5x8xf32>
    %110 = vector.extract_strided_slice %100 {offsets = [0, 32], sizes = [5, 8], strides = [1, 1]} : vector<5x96xf32> to vector<5x8xf32>
    %111 = vector.extract_strided_slice %100 {offsets = [0, 40], sizes = [5, 8], strides = [1, 1]} : vector<5x96xf32> to vector<5x8xf32>
    %112 = vector.extract_strided_slice %100 {offsets = [0, 48], sizes = [5, 8], strides = [1, 1]} : vector<5x96xf32> to vector<5x8xf32>
    %113 = vector.extract_strided_slice %100 {offsets = [0, 56], sizes = [5, 8], strides = [1, 1]} : vector<5x96xf32> to vector<5x8xf32>
    %114 = vector.shape_cast %110 : vector<5x8xf32> to vector<1x5x8xf32>
    %115 = vector.shape_cast %111 : vector<5x8xf32> to vector<1x5x8xf32>
    %116 = vector.shape_cast %112 : vector<5x8xf32> to vector<1x5x8xf32>
    %117 = vector.shape_cast %113 : vector<5x8xf32> to vector<1x5x8xf32>
    %118 = tpu.concatenate %114, %115, %116, %117 in 0 : vector<1x5x8xf32>, vector<1x5x8xf32>, vector<1x5x8xf32>, vector<1x5x8xf32> -> vector<4x5x8xf32>
    %119 = vector.extract_strided_slice %100 {offsets = [0, 64], sizes = [5, 8], strides = [1, 1]} : vector<5x96xf32> to vector<5x8xf32>
    %120 = vector.extract_strided_slice %100 {offsets = [0, 72], sizes = [5, 8], strides = [1, 1]} : vector<5x96xf32> to vector<5x8xf32>
    %121 = vector.extract_strided_slice %100 {offsets = [0, 80], sizes = [5, 8], strides = [1, 1]} : vector<5x96xf32> to vector<5x8xf32>
    %122 = vector.extract_strided_slice %100 {offsets = [0, 88], sizes = [5, 8], strides = [1, 1]} : vector<5x96xf32> to vector<5x8xf32>
    %123 = vector.shape_cast %119 : vector<5x8xf32> to vector<1x5x8xf32>
    %124 = vector.shape_cast %120 : vector<5x8xf32> to vector<1x5x8xf32>
    %125 = vector.shape_cast %121 : vector<5x8xf32> to vector<1x5x8xf32>
    %126 = vector.shape_cast %122 : vector<5x8xf32> to vector<1x5x8xf32>
    %127 = tpu.concatenate %123, %124, %125, %126 in 0 : vector<1x5x8xf32>, vector<1x5x8xf32>, vector<1x5x8xf32>, vector<1x5x8xf32> -> vector<4x5x8xf32>
    "tpu.trace_start"() <{level = 10 : i32, message = "hqd,hkd->hqk"}> : () -> ()
    %cst_36 = arith.constant dense<0.000000e+00> : vector<4x5x5xf32>
    %128 = tpu.matmul %109, %118, %cst_36 {dimension_numbers = #tpu.dot_dimension_numbers<[2], [2], [1], [1], [0, 0, 0, 1, 1, 1], [0], [0]>} : vector<4x5x8xf32>, vector<4x5x8xf32>, vector<4x5x5xf32> -> vector<4x5x5xf32>
    "tpu.trace_stop"() : () -> ()
    %cst_37 = arith.constant 0.353553385 : f32
    %129 = vector.broadcast %cst_37 : f32 to vector<4x5x5xf32>
    %130 = arith.mulf %128, %129 : vector<4x5x5xf32>
    %cst_38 = arith.constant dense<0xFF800000> : vector<4x5xf32>
    %131 = vector.multi_reduction <maximumf>, %130, %cst_38 [2] : vector<4x5x5xf32> to vector<4x5xf32>
    %132 = vector.shape_cast %131 : vector<4x5xf32> to vector<4x5x1xf32>
    %133 = vector.broadcast %132 : vector<4x5x1xf32> to vector<4x5x5xf32>
    %134 = arith.subf %130, %133 : vector<4x5x5xf32>
    %135 = math.exp %134 : vector<4x5x5xf32>
    %cst_39 = arith.constant dense<0.000000e+00> : vector<4x5xf32>
    %136 = vector.multi_reduction <add>, %135, %cst_39 [2] : vector<4x5x5xf32> to vector<4x5xf32>
    %137 = vector.shape_cast %136 : vector<4x5xf32> to vector<4x5x1xf32>
    %138 = vector.broadcast %137 : vector<4x5x1xf32> to vector<4x5x5xf32>
    %139 = arith.divf %135, %138 : vector<4x5x5xf32>
    "tpu.trace_start"() <{level = 10 : i32, message = "hqk,hkd->hqd"}> : () -> ()
    %cst_40 = arith.constant dense<0.000000e+00> : vector<4x5x8xf32>
    %140 = tpu.matmul %139, %127, %cst_40 {dimension_numbers = #tpu.dot_dimension_numbers<[2], [1], [1], [2], [0, 0, 0, 1, 1, 2], [0], [0]>} : vector<4x5x5xf32>, vector<4x5x8xf32>, vector<4x5x8xf32> -> vector<4x5x8xf32>
    "tpu.trace_stop"() : () -> ()
    %141 = vector.extract_strided_slice %140 {offsets = [0, 0, 0], sizes = [1, 5, 8], strides = [1, 1, 1]} : vector<4x5x8xf32> to vector<1x5x8xf32>
    %142 = vector.shape_cast %141 : vector<1x5x8xf32> to vector<5x8xf32>
    %143 = vector.extract_strided_slice %140 {offsets = [1, 0, 0], sizes = [1, 5, 8], strides = [1, 1, 1]} : vector<4x5x8xf32> to vector<1x5x8xf32>
    %144 = vector.shape_cast %143 : vector<1x5x8xf32> to vector<5x8xf32>
    %145 = vector.extract_strided_slice %140 {offsets = [2, 0, 0], sizes = [1, 5, 8], strides = [1, 1, 1]} : vector<4x5x8xf32> to vector<1x5x8xf32>
    %146 = vector.shape_cast %145 : vector<1x5x8xf32> to vector<5x8xf32>
    %147 = vector.extract_strided_slice %140 {offsets = [3, 0, 0], sizes = [1, 5, 8], strides = [1, 1, 1]} : vector<4x5x8xf32> to vector<1x5x8xf32>
    %148 = vector.shape_cast %147 : vector<1x5x8xf32> to vector<5x8xf32>
    %149 = tpu.concatenate %142, %144, %146, %148 in 1 : vector<5x8xf32>, vector<5x8xf32>, vector<5x8xf32>, vector<5x8xf32> -> vector<5x32xf32>
    %150 = tpu.concatenate %99, %149 in 0 : vector<5x32xf32>, vector<5x32xf32> -> vector<10x32xf32>
    %c0_41 = arith.constant 0 : index
    %c0_42 = arith.constant 0 : index
    %c0_43 = arith.constant 0 : index
    %151 = vector.load %arg11[%c0_41, %c0_42, %c0_43] : memref<2x32x32xf32, #tpu.memory_space<vmem>>, vector<1x32x32xf32>
    %152 = vector.shape_cast %151 : vector<1x32x32xf32> to vector<32x32xf32>
    %cst_44 = arith.constant dense<0.000000e+00> : vector<10x32xf32>
    %153 = tpu.matmul %150, %152, %cst_44 {dimension_numbers = #tpu.dot_dimension_numbers<[1], [0], [0], [1], [0, 0, 1, 1], [], []>} : vector<10x32xf32>, vector<32x32xf32>, vector<10x32xf32> -> vector<10x32xf32>
    %c0_45 = arith.constant 0 : index
    %c0_46 = arith.constant 0 : index
    %c0_47 = arith.constant 0 : index
    %154 = vector.load %arg12[%c0_45, %c0_46, %c0_47] : memref<2x1x32xf32, #tpu.memory_space<vmem>>, vector<1x1x32xf32>
    %155 = vector.shape_cast %154 : vector<1x1x32xf32> to vector<1x32xf32>
    %156 = vector.broadcast %155 : vector<1x32xf32> to vector<10x32xf32>
    %157 = arith.addf %153, %156 : vector<10x32xf32>
    %158 = arith.addf %16, %157 : vector<10x32xf32>
    %c0_48 = arith.constant 0 : index
    %c0_49 = arith.constant 0 : index
    %c0_50 = arith.constant 0 : index
    %159 = vector.load %arg13[%c0_48, %c0_49, %c0_50] : memref<2x1x32xf32, #tpu.memory_space<vmem>>, vector<1x1x32xf32>
    %160 = vector.shape_cast %159 : vector<1x1x32xf32> to vector<1x32xf32>
    %c0_51 = arith.constant 0 : index
    %c0_52 = arith.constant 0 : index
    %c0_53 = arith.constant 0 : index
    %161 = vector.load %arg14[%c0_51, %c0_52, %c0_53] : memref<2x1x32xf32, #tpu.memory_space<vmem>>, vector<1x1x32xf32>
    %162 = vector.shape_cast %161 : vector<1x1x32xf32> to vector<1x32xf32>
    %cst_54 = arith.constant dense<0.000000e+00> : vector<10xf32>
    %163 = vector.multi_reduction <add>, %158, %cst_54 [1] : vector<10x32xf32> to vector<10xf32>
    %164 = vector.shape_cast %163 : vector<10xf32> to vector<10x1xf32>
    %cst_55 = arith.constant 3.200000e+01 : f32
    %165 = vector.broadcast %cst_55 : f32 to vector<10x1xf32>
    %166 = arith.divf %164, %165 : vector<10x1xf32>
    %167 = vector.broadcast %166 : vector<10x1xf32> to vector<10x32xf32>
    %168 = arith.subf %158, %167 : vector<10x32xf32>
    %169 = arith.mulf %168, %168 : vector<10x32xf32>
    %cst_56 = arith.constant dense<0.000000e+00> : vector<10xf32>
    %170 = vector.multi_reduction <add>, %169, %cst_56 [1] : vector<10x32xf32> to vector<10xf32>
    %171 = vector.shape_cast %170 : vector<10xf32> to vector<10x1xf32>
    %cst_57 = arith.constant 3.200000e+01 : f32
    %172 = vector.broadcast %cst_57 : f32 to vector<10x1xf32>
    %173 = arith.divf %171, %172 : vector<10x1xf32>
    %174 = vector.broadcast %166 : vector<10x1xf32> to vector<10x32xf32>
    %175 = arith.subf %158, %174 : vector<10x32xf32>
    %cst_58 = arith.constant 9.99999974E-6 : f32
    %176 = vector.broadcast %cst_58 : f32 to vector<10x1xf32>
    %177 = arith.addf %173, %176 : vector<10x1xf32>
    %178 = math.rsqrt %177 : vector<10x1xf32>
    %179 = vector.broadcast %178 : vector<10x1xf32> to vector<10x32xf32>
    %180 = arith.mulf %175, %179 : vector<10x32xf32>
    %181 = vector.broadcast %160 : vector<1x32xf32> to vector<10x32xf32>
    %182 = arith.mulf %180, %181 : vector<10x32xf32>
    %183 = vector.broadcast %162 : vector<1x32xf32> to vector<10x32xf32>
    %184 = arith.addf %182, %183 : vector<10x32xf32>
    %c0_59 = arith.constant 0 : index
    %c0_60 = arith.constant 0 : index
    %c0_61 = arith.constant 0 : index
    %185 = vector.load %arg15[%c0_59, %c0_60, %c0_61] : memref<2x32x64xf32, #tpu.memory_space<vmem>>, vector<1x32x64xf32>
    %186 = vector.shape_cast %185 : vector<1x32x64xf32> to vector<32x64xf32>
    %cst_62 = arith.constant dense<0.000000e+00> : vector<10x64xf32>
    %187 = tpu.matmul %184, %186, %cst_62 {dimension_numbers = #tpu.dot_dimension_numbers<[1], [0], [0], [1], [0, 0, 1, 1], [], []>} : vector<10x32xf32>, vector<32x64xf32>, vector<10x64xf32> -> vector<10x64xf32>
    %c0_63 = arith.constant 0 : index
    %c0_64 = arith.constant 0 : index
    %c0_65 = arith.constant 0 : index
    %188 = vector.load %arg16[%c0_63, %c0_64, %c0_65] : memref<2x1x64xf32, #tpu.memory_space<vmem>>, vector<1x1x64xf32>
    %189 = vector.shape_cast %188 : vector<1x1x64xf32> to vector<1x64xf32>
    %190 = vector.broadcast %189 : vector<1x64xf32> to vector<10x64xf32>
    %191 = arith.addf %187, %190 : vector<10x64xf32>
    %192 = arith.mulf %191, %191 : vector<10x64xf32>
    %193 = arith.mulf %191, %192 : vector<10x64xf32>
    %cst_66 = arith.constant 4.471500e-02 : f32
    %194 = vector.broadcast %cst_66 : f32 to vector<10x64xf32>
    %195 = arith.mulf %194, %193 : vector<10x64xf32>
    %196 = arith.addf %191, %195 : vector<10x64xf32>
    %cst_67 = arith.constant 0.797884583 : f32
    %197 = vector.broadcast %cst_67 : f32 to vector<10x64xf32>
    %198 = arith.mulf %197, %196 : vector<10x64xf32>
    %199 = math.tanh %198 : vector<10x64xf32>
    %cst_68 = arith.constant 1.000000e+00 : f32
    %200 = vector.broadcast %cst_68 : f32 to vector<10x64xf32>
    %201 = arith.addf %200, %199 : vector<10x64xf32>
    %cst_69 = arith.constant 5.000000e-01 : f32
    %202 = vector.broadcast %cst_69 : f32 to vector<10x64xf32>
    %203 = arith.mulf %202, %201 : vector<10x64xf32>
    %204 = arith.mulf %191, %203 : vector<10x64xf32>
    %c0_70 = arith.constant 0 : index
    %c0_71 = arith.constant 0 : index
    %c0_72 = arith.constant 0 : index
    %205 = vector.load %arg17[%c0_70, %c0_71, %c0_72] : memref<2x64x32xf32, #tpu.memory_space<vmem>>, vector<1x64x32xf32>
    %206 = vector.shape_cast %205 : vector<1x64x32xf32> to vector<64x32xf32>
    %cst_73 = arith.constant dense<0.000000e+00> : vector<10x32xf32>
    %207 = tpu.matmul %204, %206, %cst_73 {dimension_numbers = #tpu.dot_dimension_numbers<[1], [0], [0], [1], [0, 0, 1, 1], [], []>} : vector<10x64xf32>, vector<64x32xf32>, vector<10x32xf32> -> vector<10x32xf32>
    %c0_74 = arith.constant 0 : index
    %c0_75 = arith.constant 0 : index
    %c0_76 = arith.constant 0 : index
    %208 = vector.load %arg18[%c0_74, %c0_75, %c0_76] : memref<2x1x32xf32, #tpu.memory_space<vmem>>, vector<1x1x32xf32>
    %209 = vector.shape_cast %208 : vector<1x1x32xf32> to vector<1x32xf32>
    %210 = vector.broadcast %209 : vector<1x32xf32> to vector<10x32xf32>
    %211 = arith.addf %207, %210 : vector<10x32xf32>
    %212 = arith.addf %158, %211 : vector<10x32xf32>
    %c1 = arith.constant 1 : index
    %c0_77 = arith.constant 0 : index
    %c0_78 = arith.constant 0 : index
    %213 = vector.load %arg7[%c1, %c0_77, %c0_78] : memref<2x1x32xf32, #tpu.memory_space<vmem>>, vector<1x1x32xf32>
    %214 = vector.shape_cast %213 : vector<1x1x32xf32> to vector<1x32xf32>
    %c1_79 = arith.constant 1 : index
    %c0_80 = arith.constant 0 : index
    %c0_81 = arith.constant 0 : index
    %215 = vector.load %arg8[%c1_79, %c0_80, %c0_81] : memref<2x1x32xf32, #tpu.memory_space<vmem>>, vector<1x1x32xf32>
    %216 = vector.shape_cast %215 : vector<1x1x32xf32> to vector<1x32xf32>
    %cst_82 = arith.constant dense<0.000000e+00> : vector<10xf32>
    %217 = vector.multi_reduction <add>, %212, %cst_82 [1] : vector<10x32xf32> to vector<10xf32>
    %218 = vector.shape_cast %217 : vector<10xf32> to vector<10x1xf32>
    %cst_83 = arith.constant 3.200000e+01 : f32
    %219 = vector.broadcast %cst_83 : f32 to vector<10x1xf32>
    %220 = arith.divf %218, %219 : vector<10x1xf32>
    %221 = vector.broadcast %220 : vector<10x1xf32> to vector<10x32xf32>
    %222 = arith.subf %212, %221 : vector<10x32xf32>
    %223 = arith.mulf %222, %222 : vector<10x32xf32>
    %cst_84 = arith.constant dense<0.000000e+00> : vector<10xf32>
    %224 = vector.multi_reduction <add>, %223, %cst_84 [1] : vector<10x32xf32> to vector<10xf32>
    %225 = vector.shape_cast %224 : vector<10xf32> to vector<10x1xf32>
    %cst_85 = arith.constant 3.200000e+01 : f32
    %226 = vector.broadcast %cst_85 : f32 to vector<10x1xf32>
    %227 = arith.divf %225, %226 : vector<10x1xf32>
    %228 = vector.broadcast %220 : vector<10x1xf32> to vector<10x32xf32>
    %229 = arith.subf %212, %228 : vector<10x32xf32>
    %cst_86 = arith.constant 9.99999974E-6 : f32
    %230 = vector.broadcast %cst_86 : f32 to vector<10x1xf32>
    %231 = arith.addf %227, %230 : vector<10x1xf32>
    %232 = math.rsqrt %231 : vector<10x1xf32>
    %233 = vector.broadcast %232 : vector<10x1xf32> to vector<10x32xf32>
    %234 = arith.mulf %229, %233 : vector<10x32xf32>
    %235 = vector.broadcast %214 : vector<1x32xf32> to vector<10x32xf32>
    %236 = arith.mulf %234, %235 : vector<10x32xf32>
    %237 = vector.broadcast %216 : vector<1x32xf32> to vector<10x32xf32>
    %238 = arith.addf %236, %237 : vector<10x32xf32>
    %c1_87 = arith.constant 1 : index
    %c0_88 = arith.constant 0 : index
    %c0_89 = arith.constant 0 : index
    %239 = vector.load %arg9[%c1_87, %c0_88, %c0_89] : memref<2x32x96xf32, #tpu.memory_space<vmem>>, vector<1x32x96xf32>
    %240 = vector.shape_cast %239 : vector<1x32x96xf32> to vector<32x96xf32>
    %cst_90 = arith.constant dense<0.000000e+00> : vector<10x96xf32>
    %241 = tpu.matmul %238, %240, %cst_90 {dimension_numbers = #tpu.dot_dimension_numbers<[1], [0], [0], [1], [0, 0, 1, 1], [], []>} : vector<10x32xf32>, vector<32x96xf32>, vector<10x96xf32> -> vector<10x96xf32>
    %c1_91 = arith.constant 1 : index
    %c0_92 = arith.constant 0 : index
    %c0_93 = arith.constant 0 : index
    %242 = vector.load %arg10[%c1_91, %c0_92, %c0_93] : memref<2x1x96xf32, #tpu.memory_space<vmem>>, vector<1x1x96xf32>
    %243 = vector.shape_cast %242 : vector<1x1x96xf32> to vector<1x96xf32>
    %244 = vector.broadcast %243 : vector<1x96xf32> to vector<10x96xf32>
    %245 = arith.addf %241, %244 : vector<10x96xf32>
    %246 = vector.extract_strided_slice %245 {offsets = [0, 0], sizes = [5, 96], strides = [1, 1]} : vector<10x96xf32> to vector<5x96xf32>
    %247 = vector.extract_strided_slice %246 {offsets = [0, 0], sizes = [5, 8], strides = [1, 1]} : vector<5x96xf32> to vector<5x8xf32>
    %248 = vector.extract_strided_slice %246 {offsets = [0, 8], sizes = [5, 8], strides = [1, 1]} : vector<5x96xf32> to vector<5x8xf32>
    %249 = vector.extract_strided_slice %246 {offsets = [0, 16], sizes = [5, 8], strides = [1, 1]} : vector<5x96xf32> to vector<5x8xf32>
    %250 = vector.extract_strided_slice %246 {offsets = [0, 24], sizes = [5, 8], strides = [1, 1]} : vector<5x96xf32> to vector<5x8xf32>
    %251 = vector.shape_cast %247 : vector<5x8xf32> to vector<1x5x8xf32>
    %252 = vector.shape_cast %248 : vector<5x8xf32> to vector<1x5x8xf32>
    %253 = vector.shape_cast %249 : vector<5x8xf32> to vector<1x5x8xf32>
    %254 = vector.shape_cast %250 : vector<5x8xf32> to vector<1x5x8xf32>
    %255 = tpu.concatenate %251, %252, %253, %254 in 0 : vector<1x5x8xf32>, vector<1x5x8xf32>, vector<1x5x8xf32>, vector<1x5x8xf32> -> vector<4x5x8xf32>
    %256 = vector.extract_strided_slice %246 {offsets = [0, 32], sizes = [5, 8], strides = [1, 1]} : vector<5x96xf32> to vector<5x8xf32>
    %257 = vector.extract_strided_slice %246 {offsets = [0, 40], sizes = [5, 8], strides = [1, 1]} : vector<5x96xf32> to vector<5x8xf32>
    %258 = vector.extract_strided_slice %246 {offsets = [0, 48], sizes = [5, 8], strides = [1, 1]} : vector<5x96xf32> to vector<5x8xf32>
    %259 = vector.extract_strided_slice %246 {offsets = [0, 56], sizes = [5, 8], strides = [1, 1]} : vector<5x96xf32> to vector<5x8xf32>
    %260 = vector.shape_cast %256 : vector<5x8xf32> to vector<1x5x8xf32>
    %261 = vector.shape_cast %257 : vector<5x8xf32> to vector<1x5x8xf32>
    %262 = vector.shape_cast %258 : vector<5x8xf32> to vector<1x5x8xf32>
    %263 = vector.shape_cast %259 : vector<5x8xf32> to vector<1x5x8xf32>
    %264 = tpu.concatenate %260, %261, %262, %263 in 0 : vector<1x5x8xf32>, vector<1x5x8xf32>, vector<1x5x8xf32>, vector<1x5x8xf32> -> vector<4x5x8xf32>
    %265 = vector.extract_strided_slice %246 {offsets = [0, 64], sizes = [5, 8], strides = [1, 1]} : vector<5x96xf32> to vector<5x8xf32>
    %266 = vector.extract_strided_slice %246 {offsets = [0, 72], sizes = [5, 8], strides = [1, 1]} : vector<5x96xf32> to vector<5x8xf32>
    %267 = vector.extract_strided_slice %246 {offsets = [0, 80], sizes = [5, 8], strides = [1, 1]} : vector<5x96xf32> to vector<5x8xf32>
    %268 = vector.extract_strided_slice %246 {offsets = [0, 88], sizes = [5, 8], strides = [1, 1]} : vector<5x96xf32> to vector<5x8xf32>
    %269 = vector.shape_cast %265 : vector<5x8xf32> to vector<1x5x8xf32>
    %270 = vector.shape_cast %266 : vector<5x8xf32> to vector<1x5x8xf32>
    %271 = vector.shape_cast %267 : vector<5x8xf32> to vector<1x5x8xf32>
    %272 = vector.shape_cast %268 : vector<5x8xf32> to vector<1x5x8xf32>
    %273 = tpu.concatenate %269, %270, %271, %272 in 0 : vector<1x5x8xf32>, vector<1x5x8xf32>, vector<1x5x8xf32>, vector<1x5x8xf32> -> vector<4x5x8xf32>
    "tpu.trace_start"() <{level = 10 : i32, message = "hqd,hkd->hqk"}> : () -> ()
    %cst_94 = arith.constant dense<0.000000e+00> : vector<4x5x5xf32>
    %274 = tpu.matmul %255, %264, %cst_94 {dimension_numbers = #tpu.dot_dimension_numbers<[2], [2], [1], [1], [0, 0, 0, 1, 1, 1], [0], [0]>} : vector<4x5x8xf32>, vector<4x5x8xf32>, vector<4x5x5xf32> -> vector<4x5x5xf32>
    "tpu.trace_stop"() : () -> ()
    %cst_95 = arith.constant 0.353553385 : f32
    %275 = vector.broadcast %cst_95 : f32 to vector<4x5x5xf32>
    %276 = arith.mulf %274, %275 : vector<4x5x5xf32>
    %cst_96 = arith.constant dense<0xFF800000> : vector<4x5xf32>
    %277 = vector.multi_reduction <maximumf>, %276, %cst_96 [2] : vector<4x5x5xf32> to vector<4x5xf32>
    %278 = vector.shape_cast %277 : vector<4x5xf32> to vector<4x5x1xf32>
    %279 = vector.broadcast %278 : vector<4x5x1xf32> to vector<4x5x5xf32>
    %280 = arith.subf %276, %279 : vector<4x5x5xf32>
    %281 = math.exp %280 : vector<4x5x5xf32>
    %cst_97 = arith.constant dense<0.000000e+00> : vector<4x5xf32>
    %282 = vector.multi_reduction <add>, %281, %cst_97 [2] : vector<4x5x5xf32> to vector<4x5xf32>
    %283 = vector.shape_cast %282 : vector<4x5xf32> to vector<4x5x1xf32>
    %284 = vector.broadcast %283 : vector<4x5x1xf32> to vector<4x5x5xf32>
    %285 = arith.divf %281, %284 : vector<4x5x5xf32>
    "tpu.trace_start"() <{level = 10 : i32, message = "hqk,hkd->hqd"}> : () -> ()
    %cst_98 = arith.constant dense<0.000000e+00> : vector<4x5x8xf32>
    %286 = tpu.matmul %285, %273, %cst_98 {dimension_numbers = #tpu.dot_dimension_numbers<[2], [1], [1], [2], [0, 0, 0, 1, 1, 2], [0], [0]>} : vector<4x5x5xf32>, vector<4x5x8xf32>, vector<4x5x8xf32> -> vector<4x5x8xf32>
    "tpu.trace_stop"() : () -> ()
    %287 = vector.extract_strided_slice %286 {offsets = [0, 0, 0], sizes = [1, 5, 8], strides = [1, 1, 1]} : vector<4x5x8xf32> to vector<1x5x8xf32>
    %288 = vector.shape_cast %287 : vector<1x5x8xf32> to vector<5x8xf32>
    %289 = vector.extract_strided_slice %286 {offsets = [1, 0, 0], sizes = [1, 5, 8], strides = [1, 1, 1]} : vector<4x5x8xf32> to vector<1x5x8xf32>
    %290 = vector.shape_cast %289 : vector<1x5x8xf32> to vector<5x8xf32>
    %291 = vector.extract_strided_slice %286 {offsets = [2, 0, 0], sizes = [1, 5, 8], strides = [1, 1, 1]} : vector<4x5x8xf32> to vector<1x5x8xf32>
    %292 = vector.shape_cast %291 : vector<1x5x8xf32> to vector<5x8xf32>
    %293 = vector.extract_strided_slice %286 {offsets = [3, 0, 0], sizes = [1, 5, 8], strides = [1, 1, 1]} : vector<4x5x8xf32> to vector<1x5x8xf32>
    %294 = vector.shape_cast %293 : vector<1x5x8xf32> to vector<5x8xf32>
    %295 = tpu.concatenate %288, %290, %292, %294 in 1 : vector<5x8xf32>, vector<5x8xf32>, vector<5x8xf32>, vector<5x8xf32> -> vector<5x32xf32>
    %296 = vector.extract_strided_slice %245 {offsets = [5, 0], sizes = [5, 96], strides = [1, 1]} : vector<10x96xf32> to vector<5x96xf32>
    %297 = vector.extract_strided_slice %296 {offsets = [0, 0], sizes = [5, 8], strides = [1, 1]} : vector<5x96xf32> to vector<5x8xf32>
    %298 = vector.extract_strided_slice %296 {offsets = [0, 8], sizes = [5, 8], strides = [1, 1]} : vector<5x96xf32> to vector<5x8xf32>
    %299 = vector.extract_strided_slice %296 {offsets = [0, 16], sizes = [5, 8], strides = [1, 1]} : vector<5x96xf32> to vector<5x8xf32>
    %300 = vector.extract_strided_slice %296 {offsets = [0, 24], sizes = [5, 8], strides = [1, 1]} : vector<5x96xf32> to vector<5x8xf32>
    %301 = vector.shape_cast %297 : vector<5x8xf32> to vector<1x5x8xf32>
    %302 = vector.shape_cast %298 : vector<5x8xf32> to vector<1x5x8xf32>
    %303 = vector.shape_cast %299 : vector<5x8xf32> to vector<1x5x8xf32>
    %304 = vector.shape_cast %300 : vector<5x8xf32> to vector<1x5x8xf32>
    %305 = tpu.concatenate %301, %302, %303, %304 in 0 : vector<1x5x8xf32>, vector<1x5x8xf32>, vector<1x5x8xf32>, vector<1x5x8xf32> -> vector<4x5x8xf32>
    %306 = vector.extract_strided_slice %296 {offsets = [0, 32], sizes = [5, 8], strides = [1, 1]} : vector<5x96xf32> to vector<5x8xf32>
    %307 = vector.extract_strided_slice %296 {offsets = [0, 40], sizes = [5, 8], strides = [1, 1]} : vector<5x96xf32> to vector<5x8xf32>
    %308 = vector.extract_strided_slice %296 {offsets = [0, 48], sizes = [5, 8], strides = [1, 1]} : vector<5x96xf32> to vector<5x8xf32>
    %309 = vector.extract_strided_slice %296 {offsets = [0, 56], sizes = [5, 8], strides = [1, 1]} : vector<5x96xf32> to vector<5x8xf32>
    %310 = vector.shape_cast %306 : vector<5x8xf32> to vector<1x5x8xf32>
    %311 = vector.shape_cast %307 : vector<5x8xf32> to vector<1x5x8xf32>
    %312 = vector.shape_cast %308 : vector<5x8xf32> to vector<1x5x8xf32>
    %313 = vector.shape_cast %309 : vector<5x8xf32> to vector<1x5x8xf32>
    %314 = tpu.concatenate %310, %311, %312, %313 in 0 : vector<1x5x8xf32>, vector<1x5x8xf32>, vector<1x5x8xf32>, vector<1x5x8xf32> -> vector<4x5x8xf32>
    %315 = vector.extract_strided_slice %296 {offsets = [0, 64], sizes = [5, 8], strides = [1, 1]} : vector<5x96xf32> to vector<5x8xf32>
    %316 = vector.extract_strided_slice %296 {offsets = [0, 72], sizes = [5, 8], strides = [1, 1]} : vector<5x96xf32> to vector<5x8xf32>
    %317 = vector.extract_strided_slice %296 {offsets = [0, 80], sizes = [5, 8], strides = [1, 1]} : vector<5x96xf32> to vector<5x8xf32>
    %318 = vector.extract_strided_slice %296 {offsets = [0, 88], sizes = [5, 8], strides = [1, 1]} : vector<5x96xf32> to vector<5x8xf32>
    %319 = vector.shape_cast %315 : vector<5x8xf32> to vector<1x5x8xf32>
    %320 = vector.shape_cast %316 : vector<5x8xf32> to vector<1x5x8xf32>
    %321 = vector.shape_cast %317 : vector<5x8xf32> to vector<1x5x8xf32>
    %322 = vector.shape_cast %318 : vector<5x8xf32> to vector<1x5x8xf32>
    %323 = tpu.concatenate %319, %320, %321, %322 in 0 : vector<1x5x8xf32>, vector<1x5x8xf32>, vector<1x5x8xf32>, vector<1x5x8xf32> -> vector<4x5x8xf32>
    "tpu.trace_start"() <{level = 10 : i32, message = "hqd,hkd->hqk"}> : () -> ()
    %cst_99 = arith.constant dense<0.000000e+00> : vector<4x5x5xf32>
    %324 = tpu.matmul %305, %314, %cst_99 {dimension_numbers = #tpu.dot_dimension_numbers<[2], [2], [1], [1], [0, 0, 0, 1, 1, 1], [0], [0]>} : vector<4x5x8xf32>, vector<4x5x8xf32>, vector<4x5x5xf32> -> vector<4x5x5xf32>
    "tpu.trace_stop"() : () -> ()
    %cst_100 = arith.constant 0.353553385 : f32
    %325 = vector.broadcast %cst_100 : f32 to vector<4x5x5xf32>
    %326 = arith.mulf %324, %325 : vector<4x5x5xf32>
    %cst_101 = arith.constant dense<0xFF800000> : vector<4x5xf32>
    %327 = vector.multi_reduction <maximumf>, %326, %cst_101 [2] : vector<4x5x5xf32> to vector<4x5xf32>
    %328 = vector.shape_cast %327 : vector<4x5xf32> to vector<4x5x1xf32>
    %329 = vector.broadcast %328 : vector<4x5x1xf32> to vector<4x5x5xf32>
    %330 = arith.subf %326, %329 : vector<4x5x5xf32>
    %331 = math.exp %330 : vector<4x5x5xf32>
    %cst_102 = arith.constant dense<0.000000e+00> : vector<4x5xf32>
    %332 = vector.multi_reduction <add>, %331, %cst_102 [2] : vector<4x5x5xf32> to vector<4x5xf32>
    %333 = vector.shape_cast %332 : vector<4x5xf32> to vector<4x5x1xf32>
    %334 = vector.broadcast %333 : vector<4x5x1xf32> to vector<4x5x5xf32>
    %335 = arith.divf %331, %334 : vector<4x5x5xf32>
    "tpu.trace_start"() <{level = 10 : i32, message = "hqk,hkd->hqd"}> : () -> ()
    %cst_103 = arith.constant dense<0.000000e+00> : vector<4x5x8xf32>
    %336 = tpu.matmul %335, %323, %cst_103 {dimension_numbers = #tpu.dot_dimension_numbers<[2], [1], [1], [2], [0, 0, 0, 1, 1, 2], [0], [0]>} : vector<4x5x5xf32>, vector<4x5x8xf32>, vector<4x5x8xf32> -> vector<4x5x8xf32>
    "tpu.trace_stop"() : () -> ()
    %337 = vector.extract_strided_slice %336 {offsets = [0, 0, 0], sizes = [1, 5, 8], strides = [1, 1, 1]} : vector<4x5x8xf32> to vector<1x5x8xf32>
    %338 = vector.shape_cast %337 : vector<1x5x8xf32> to vector<5x8xf32>
    %339 = vector.extract_strided_slice %336 {offsets = [1, 0, 0], sizes = [1, 5, 8], strides = [1, 1, 1]} : vector<4x5x8xf32> to vector<1x5x8xf32>
    %340 = vector.shape_cast %339 : vector<1x5x8xf32> to vector<5x8xf32>
    %341 = vector.extract_strided_slice %336 {offsets = [2, 0, 0], sizes = [1, 5, 8], strides = [1, 1, 1]} : vector<4x5x8xf32> to vector<1x5x8xf32>
    %342 = vector.shape_cast %341 : vector<1x5x8xf32> to vector<5x8xf32>
    %343 = vector.extract_strided_slice %336 {offsets = [3, 0, 0], sizes = [1, 5, 8], strides = [1, 1, 1]} : vector<4x5x8xf32> to vector<1x5x8xf32>
    %344 = vector.shape_cast %343 : vector<1x5x8xf32> to vector<5x8xf32>
    %345 = tpu.concatenate %338, %340, %342, %344 in 1 : vector<5x8xf32>, vector<5x8xf32>, vector<5x8xf32>, vector<5x8xf32> -> vector<5x32xf32>
    %346 = tpu.concatenate %295, %345 in 0 : vector<5x32xf32>, vector<5x32xf32> -> vector<10x32xf32>
    %c1_104 = arith.constant 1 : index
    %c0_105 = arith.constant 0 : index
    %c0_106 = arith.constant 0 : index
    %347 = vector.load %arg11[%c1_104, %c0_105, %c0_106] : memref<2x32x32xf32, #tpu.memory_space<vmem>>, vector<1x32x32xf32>
    %348 = vector.shape_cast %347 : vector<1x32x32xf32> to vector<32x32xf32>
    %cst_107 = arith.constant dense<0.000000e+00> : vector<10x32xf32>
    %349 = tpu.matmul %346, %348, %cst_107 {dimension_numbers = #tpu.dot_dimension_numbers<[1], [0], [0], [1], [0, 0, 1, 1], [], []>} : vector<10x32xf32>, vector<32x32xf32>, vector<10x32xf32> -> vector<10x32xf32>
    %c1_108 = arith.constant 1 : index
    %c0_109 = arith.constant 0 : index
    %c0_110 = arith.constant 0 : index
    %350 = vector.load %arg12[%c1_108, %c0_109, %c0_110] : memref<2x1x32xf32, #tpu.memory_space<vmem>>, vector<1x1x32xf32>
    %351 = vector.shape_cast %350 : vector<1x1x32xf32> to vector<1x32xf32>
    %352 = vector.broadcast %351 : vector<1x32xf32> to vector<10x32xf32>
    %353 = arith.addf %349, %352 : vector<10x32xf32>
    %354 = arith.addf %212, %353 : vector<10x32xf32>
    %c1_111 = arith.constant 1 : index
    %c0_112 = arith.constant 0 : index
    %c0_113 = arith.constant 0 : index
    %355 = vector.load %arg13[%c1_111, %c0_112, %c0_113] : memref<2x1x32xf32, #tpu.memory_space<vmem>>, vector<1x1x32xf32>
    %356 = vector.shape_cast %355 : vector<1x1x32xf32> to vector<1x32xf32>
    %c1_114 = arith.constant 1 : index
    %c0_115 = arith.constant 0 : index
    %c0_116 = arith.constant 0 : index
    %357 = vector.load %arg14[%c1_114, %c0_115, %c0_116] : memref<2x1x32xf32, #tpu.memory_space<vmem>>, vector<1x1x32xf32>
    %358 = vector.shape_cast %357 : vector<1x1x32xf32> to vector<1x32xf32>
    %cst_117 = arith.constant dense<0.000000e+00> : vector<10xf32>
    %359 = vector.multi_reduction <add>, %354, %cst_117 [1] : vector<10x32xf32> to vector<10xf32>
    %360 = vector.shape_cast %359 : vector<10xf32> to vector<10x1xf32>
    %cst_118 = arith.constant 3.200000e+01 : f32
    %361 = vector.broadcast %cst_118 : f32 to vector<10x1xf32>
    %362 = arith.divf %360, %361 : vector<10x1xf32>
    %363 = vector.broadcast %362 : vector<10x1xf32> to vector<10x32xf32>
    %364 = arith.subf %354, %363 : vector<10x32xf32>
    %365 = arith.mulf %364, %364 : vector<10x32xf32>
    %cst_119 = arith.constant dense<0.000000e+00> : vector<10xf32>
    %366 = vector.multi_reduction <add>, %365, %cst_119 [1] : vector<10x32xf32> to vector<10xf32>
    %367 = vector.shape_cast %366 : vector<10xf32> to vector<10x1xf32>
    %cst_120 = arith.constant 3.200000e+01 : f32
    %368 = vector.broadcast %cst_120 : f32 to vector<10x1xf32>
    %369 = arith.divf %367, %368 : vector<10x1xf32>
    %370 = vector.broadcast %362 : vector<10x1xf32> to vector<10x32xf32>
    %371 = arith.subf %354, %370 : vector<10x32xf32>
    %cst_121 = arith.constant 9.99999974E-6 : f32
    %372 = vector.broadcast %cst_121 : f32 to vector<10x1xf32>
    %373 = arith.addf %369, %372 : vector<10x1xf32>
    %374 = math.rsqrt %373 : vector<10x1xf32>
    %375 = vector.broadcast %374 : vector<10x1xf32> to vector<10x32xf32>
    %376 = arith.mulf %371, %375 : vector<10x32xf32>
    %377 = vector.broadcast %356 : vector<1x32xf32> to vector<10x32xf32>
    %378 = arith.mulf %376, %377 : vector<10x32xf32>
    %379 = vector.broadcast %358 : vector<1x32xf32> to vector<10x32xf32>
    %380 = arith.addf %378, %379 : vector<10x32xf32>
    %c1_122 = arith.constant 1 : index
    %c0_123 = arith.constant 0 : index
    %c0_124 = arith.constant 0 : index
    %381 = vector.load %arg15[%c1_122, %c0_123, %c0_124] : memref<2x32x64xf32, #tpu.memory_space<vmem>>, vector<1x32x64xf32>
    %382 = vector.shape_cast %381 : vector<1x32x64xf32> to vector<32x64xf32>
    %cst_125 = arith.constant dense<0.000000e+00> : vector<10x64xf32>
    %383 = tpu.matmul %380, %382, %cst_125 {dimension_numbers = #tpu.dot_dimension_numbers<[1], [0], [0], [1], [0, 0, 1, 1], [], []>} : vector<10x32xf32>, vector<32x64xf32>, vector<10x64xf32> -> vector<10x64xf32>
    %c1_126 = arith.constant 1 : index
    %c0_127 = arith.constant 0 : index
    %c0_128 = arith.constant 0 : index
    %384 = vector.load %arg16[%c1_126, %c0_127, %c0_128] : memref<2x1x64xf32, #tpu.memory_space<vmem>>, vector<1x1x64xf32>
    %385 = vector.shape_cast %384 : vector<1x1x64xf32> to vector<1x64xf32>
    %386 = vector.broadcast %385 : vector<1x64xf32> to vector<10x64xf32>
    %387 = arith.addf %383, %386 : vector<10x64xf32>
    %388 = arith.mulf %387, %387 : vector<10x64xf32>
    %389 = arith.mulf %387, %388 : vector<10x64xf32>
    %cst_129 = arith.constant 4.471500e-02 : f32
    %390 = vector.broadcast %cst_129 : f32 to vector<10x64xf32>
    %391 = arith.mulf %390, %389 : vector<10x64xf32>
    %392 = arith.addf %387, %391 : vector<10x64xf32>
    %cst_130 = arith.constant 0.797884583 : f32
    %393 = vector.broadcast %cst_130 : f32 to vector<10x64xf32>
    %394 = arith.mulf %393, %392 : vector<10x64xf32>
    %395 = math.tanh %394 : vector<10x64xf32>
    %cst_131 = arith.constant 1.000000e+00 : f32
    %396 = vector.broadcast %cst_131 : f32 to vector<10x64xf32>
    %397 = arith.addf %396, %395 : vector<10x64xf32>
    %cst_132 = arith.constant 5.000000e-01 : f32
    %398 = vector.broadcast %cst_132 : f32 to vector<10x64xf32>
    %399 = arith.mulf %398, %397 : vector<10x64xf32>
    %400 = arith.mulf %387, %399 : vector<10x64xf32>
    %c1_133 = arith.constant 1 : index
    %c0_134 = arith.constant 0 : index
    %c0_135 = arith.constant 0 : index
    %401 = vector.load %arg17[%c1_133, %c0_134, %c0_135] : memref<2x64x32xf32, #tpu.memory_space<vmem>>, vector<1x64x32xf32>
    %402 = vector.shape_cast %401 : vector<1x64x32xf32> to vector<64x32xf32>
    %cst_136 = arith.constant dense<0.000000e+00> : vector<10x32xf32>
    %403 = tpu.matmul %400, %402, %cst_136 {dimension_numbers = #tpu.dot_dimension_numbers<[1], [0], [0], [1], [0, 0, 1, 1], [], []>} : vector<10x64xf32>, vector<64x32xf32>, vector<10x32xf32> -> vector<10x32xf32>
    %c1_137 = arith.constant 1 : index
    %c0_138 = arith.constant 0 : index
    %c0_139 = arith.constant 0 : index
    %404 = vector.load %arg18[%c1_137, %c0_138, %c0_139] : memref<2x1x32xf32, #tpu.memory_space<vmem>>, vector<1x1x32xf32>
    %405 = vector.shape_cast %404 : vector<1x1x32xf32> to vector<1x32xf32>
    %406 = vector.broadcast %405 : vector<1x32xf32> to vector<10x32xf32>
    %407 = arith.addf %403, %406 : vector<10x32xf32>
    %408 = arith.addf %354, %407 : vector<10x32xf32>
    %c0_140 = arith.constant 0 : index
    %c0_141 = arith.constant 0 : index
    %409 = vector.load %arg19[%c0_140, %c0_141] : memref<1x32xf32, #tpu.memory_space<vmem>>, vector<1x32xf32>
    %c0_142 = arith.constant 0 : index
    %c0_143 = arith.constant 0 : index
    %410 = vector.load %arg20[%c0_142, %c0_143] : memref<1x32xf32, #tpu.memory_space<vmem>>, vector<1x32xf32>
    %cst_144 = arith.constant dense<0.000000e+00> : vector<10xf32>
    %411 = vector.multi_reduction <add>, %408, %cst_144 [1] : vector<10x32xf32> to vector<10xf32>
    %412 = vector.shape_cast %411 : vector<10xf32> to vector<10x1xf32>
    %cst_145 = arith.constant 3.200000e+01 : f32
    %413 = vector.broadcast %cst_145 : f32 to vector<10x1xf32>
    %414 = arith.divf %412, %413 : vector<10x1xf32>
    %415 = vector.broadcast %414 : vector<10x1xf32> to vector<10x32xf32>
    %416 = arith.subf %408, %415 : vector<10x32xf32>
    %417 = arith.mulf %416, %416 : vector<10x32xf32>
    %cst_146 = arith.constant dense<0.000000e+00> : vector<10xf32>
    %418 = vector.multi_reduction <add>, %417, %cst_146 [1] : vector<10x32xf32> to vector<10xf32>
    %419 = vector.shape_cast %418 : vector<10xf32> to vector<10x1xf32>
    %cst_147 = arith.constant 3.200000e+01 : f32
    %420 = vector.broadcast %cst_147 : f32 to vector<10x1xf32>
    %421 = arith.divf %419, %420 : vector<10x1xf32>
    %422 = vector.broadcast %414 : vector<10x1xf32> to vector<10x32xf32>
    %423 = arith.subf %408, %422 : vector<10x32xf32>
    %cst_148 = arith.constant 9.99999974E-6 : f32
    %424 = vector.broadcast %cst_148 : f32 to vector<10x1xf32>
    %425 = arith.addf %421, %424 : vector<10x1xf32>
    %426 = math.rsqrt %425 : vector<10x1xf32>
    %427 = vector.broadcast %426 : vector<10x1xf32> to vector<10x32xf32>
    %428 = arith.mulf %423, %427 : vector<10x32xf32>
    %429 = vector.broadcast %409 : vector<1x32xf32> to vector<10x32xf32>
    %430 = arith.mulf %428, %429 : vector<10x32xf32>
    %431 = vector.broadcast %410 : vector<1x32xf32> to vector<10x32xf32>
    %432 = arith.addf %430, %431 : vector<10x32xf32>
    %c0_149 = arith.constant 0 : index
    %c0_150 = arith.constant 0 : index
    %433 = vector.load %arg21[%c0_149, %c0_150] : memref<10x32xf32, #tpu.memory_space<vmem>>, vector<10x32xf32>
    tpu.vector_store %arg21[%c0_149, %c0_150], %432 {strides = array<i32>} : memref<10x32xf32, #tpu.memory_space<vmem>>, vector<10x32xf32>,
    return
  }
  func.func @transform_0(%arg0: i32) -> (i32, i32) {
    %c0_i32 = arith.constant 0 : i32
    %c0_i32_0 = arith.constant 0 : i32
    %c0_i32_1 = arith.constant 0 : i32
    return %c0_i32, %c0_i32_0 : i32, i32
  }
  func.func @transform_1(%arg0: i32) -> (i32, i32) {
    %c0_i32 = arith.constant 0 : i32
    %c0_i32_0 = arith.constant 0 : i32
    %c0_i32_1 = arith.constant 0 : i32
    return %c0_i32, %c0_i32_0 : i32, i32
  }
  func.func @transform_2(%arg0: i32) -> (i32, i32) {
    %c0_i32 = arith.constant 0 : i32
    %c0_i32_0 = arith.constant 0 : i32
    %c0_i32_1 = arith.constant 0 : i32
    return %c0_i32, %c0_i32_0 : i32, i32
  }
  func.func @transform_3(%arg0: i32) -> (i32, i32) {
    %c0_i32 = arith.constant 0 : i32
    %c0_i32_0 = arith.constant 0 : i32
    %c0_i32_1 = arith.constant 0 : i32
    return %c0_i32, %c0_i32_0 : i32, i32
  }
  func.func @transform_4(%arg0: i32) -> (i32, i32) {
    %c0_i32 = arith.constant 0 : i32
    %c0_i32_0 = arith.constant 0 : i32
    %c0_i32_1 = arith.constant 0 : i32
    return %c0_i32, %c0_i32_0 : i32, i32
  }
  func.func @transform_5(%arg0: i32) -> (i32, i32) {
    %c0_i32 = arith.constant 0 : i32
    %c0_i32_0 = arith.constant 0 : i32
    %c0_i32_1 = arith.constant 0 : i32
    return %c0_i32, %c0_i32_0 : i32, i32
  }
  func.func @transform_6(%arg0: i32) -> (i32, i32, i32) {
    %c0_i32 = arith.constant 0 : i32
    %c0_i32_0 = arith.constant 0 : i32
    %c0_i32_1 = arith.constant 0 : i32
    %c0_i32_2 = arith.constant 0 : i32
    return %c0_i32, %c0_i32_0, %c0_i32_1 : i32, i32, i32
  }
  func.func @transform_7(%arg0: i32) -> (i32, i32, i32) {
    %c0_i32 = arith.constant 0 : i32
    %c0_i32_0 = arith.constant 0 : i32
    %c0_i32_1 = arith.constant 0 : i32
    %c0_i32_2 = arith.constant 0 : i32
    return %c0_i32, %c0_i32_0, %c0_i32_1 : i32, i32, i32
  }
  func.func @transform_8(%arg0: i32) -> (i32, i32, i32) {
    %c0_i32 = arith.constant 0 : i32
    %c0_i32_0 = arith.constant 0 : i32
    %c0_i32_1 = arith.constant 0 : i32
    %c0_i32_2 = arith.constant 0 : i32
    return %c0_i32, %c0_i32_0, %c0_i32_1 : i32, i32, i32
  }
  func.func @transform_9(%arg0: i32) -> (i32, i32, i32) {
    %c0_i32 = arith.constant 0 : i32
    %c0_i32_0 = arith.constant 0 : i32
    %c0_i32_1 = arith.constant 0 : i32
    %c0_i32_2 = arith.constant 0 : i32
    return %c0_i32, %c0_i32_0, %c0_i32_1 : i32, i32, i32
  }
  func.func @transform_10(%arg0: i32) -> (i32, i32, i32) {
    %c0_i32 = arith.constant 0 : i32
    %c0_i32_0 = arith.constant 0 : i32
    %c0_i32_1 = arith.constant 0 : i32
    %c0_i32_2 = arith.constant 0 : i32
    return %c0_i32, %c0_i32_0, %c0_i32_1 : i32, i32, i32
  }
  func.func @transform_11(%arg0: i32) -> (i32, i32, i32) {
    %c0_i32 = arith.constant 0 : i32
    %c0_i32_0 = arith.constant 0 : i32
    %c0_i32_1 = arith.constant 0 : i32
    %c0_i32_2 = arith.constant 0 : i32
    return %c0_i32, %c0_i32_0, %c0_i32_1 : i32, i32, i32
  }
  func.func @transform_12(%arg0: i32) -> (i32, i32, i32) {
    %c0_i32 = arith.constant 0 : i32
    %c0_i32_0 = arith.constant 0 : i32
    %c0_i32_1 = arith.constant 0 : i32
    %c0_i32_2 = arith.constant 0 : i32
    return %c0_i32, %c0_i32_0, %c0_i32_1 : i32, i32, i32
  }
  func.func @transform_13(%arg0: i32) -> (i32, i32, i32) {
    %c0_i32 = arith.constant 0 : i32
    %c0_i32_0 = arith.constant 0 : i32
    %c0_i32_1 = arith.constant 0 : i32
    %c0_i32_2 = arith.constant 0 : i32
    return %c0_i32, %c0_i32_0, %c0_i32_1 : i32, i32, i32
  }
  func.func @transform_14(%arg0: i32) -> (i32, i32, i32) {
    %c0_i32 = arith.constant 0 : i32
    %c0_i32_0 = arith.constant 0 : i32
    %c0_i32_1 = arith.constant 0 : i32
    %c0_i32_2 = arith.constant 0 : i32
    return %c0_i32, %c0_i32_0, %c0_i32_1 : i32, i32, i32
  }
  func.func @transform_15(%arg0: i32) -> (i32, i32, i32) {
    %c0_i32 = arith.constant 0 : i32
    %c0_i32_0 = arith.constant 0 : i32
    %c0_i32_1 = arith.constant 0 : i32
    %c0_i32_2 = arith.constant 0 : i32
    return %c0_i32, %c0_i32_0, %c0_i32_1 : i32, i32, i32
  }
  func.func @transform_16(%arg0: i32) -> (i32, i32, i32) {
    %c0_i32 = arith.constant 0 : i32
    %c0_i32_0 = arith.constant 0 : i32
    %c0_i32_1 = arith.constant 0 : i32
    %c0_i32_2 = arith.constant 0 : i32
    return %c0_i32, %c0_i32_0, %c0_i32_1 : i32, i32, i32
  }
  func.func @transform_17(%arg0: i32) -> (i32, i32, i32) {
    %c0_i32 = arith.constant 0 : i32
    %c0_i32_0 = arith.constant 0 : i32
    %c0_i32_1 = arith.constant 0 : i32
    %c0_i32_2 = arith.constant 0 : i32
    return %c0_i32, %c0_i32_0, %c0_i32_1 : i32, i32, i32
  }
  func.func @transform_18(%arg0: i32) -> (i32, i32) {
    %c0_i32 = arith.constant 0 : i32
    %c0_i32_0 = arith.constant 0 : i32
    %c0_i32_1 = arith.constant 0 : i32
    return %c0_i32, %c0_i32_0 : i32, i32
  }
  func.func @transform_19(%arg0: i32) -> (i32, i32) {
    %c0_i32 = arith.constant 0 : i32
    %c0_i32_0 = arith.constant 0 : i32
    %c0_i32_1 = arith.constant 0 : i32
    return %c0_i32, %c0_i32_0 : i32, i32
  }
  func.func @transform_20(%arg0: i32) -> (i32, i32) {
    %c0_i32 = arith.constant 0 : i32
    %c0_i32_0 = arith.constant 0 : i32
    %c0_i32_1 = arith.constant 0 : i32
    return %c0_i32, %c0_i32_0 : i32, i32
  }
}

</mosaic_0001>

<bundles_post_ra>
// kernel: vit_encoder_forward.1
= control target key start
LH: loop header
LB: loop body
LE: loop exit
PB: predicated region body
PF: predicated region fallthrough
CT: control target
= control target key end

     0   :  { %v4702_v0 = vmov 0.0|0.0   ;;  %vm4703_vm0 = vmmov 0   ;;  %v4704_v4 = vmov 0.0   ;;  %vm79_vm1 = vcmask 392192   ;;  %s4706_s29 = smov 120   ;;  %s4708_s30 = smov 96   ;;  %s5507_s2 = inlined_call_operand.vmem [shape: f32[48,32], index: 2, kind: input, shape index: {}]   ;;  %s5508_s0 = inlined_call_operand.vmem [shape: f32[8,48], index: 0, kind: input, shape index: {}]   ;;  %s5509_s3 = inlined_call_operand.vmem [shape: f32[1,32], index: 3, kind: input, shape index: {}]   ;;  %s5510_s5 = inlined_call_operand.vmem [shape: f32[1,32], index: 5, kind: input, shape index: {}]   ;;  %s5511_s4 = inlined_call_operand.vmem [shape: f32[1,32], index: 4, kind: input, shape index: {}]   ;;  %s5512_s1 = inlined_call_operand.vmem [shape: f32[8,32], index: 1, kind: input, shape index: {}]   ;;  %s5513_s8 = inlined_call_operand.vmem [shape: f32[2,32,96], index: 8, kind: input, shape index: {}]   ;;  %s5514_s6 = inlined_call_operand.vmem [shape: f32[2,1,32], index: 6, kind: input, shape index: {}]   ;;  %s5515_s7 = inlined_call_operand.vmem [shape: f32[2,1,32], index: 7, kind: input, shape index: {}]   ;;  %s5516_s9 = inlined_call_operand.vmem [shape: f32[2,1,96], index: 9, kind: input, shape index: {}]   ;;  %s5517_s10 = inlined_call_operand.vmem [shape: f32[2,32,32], index: 10, kind: input, shape index: {}]   ;;  %s5518_s11 = inlined_call_operand.vmem [shape: f32[2,1,32], index: 11, kind: input, shape index: {}]   ;;  %s5519_s14 = inlined_call_operand.vmem [shape: f32[2,32,64], index: 14, kind: input, shape index: {}]   ;;  %s5520_s12 = inlined_call_operand.vmem [shape: f32[2,1,32], index: 12, kind: input, shape index: {}]   ;;  %s5521_s13 = inlined_call_operand.vmem [shape: f32[2,1,32], index: 13, kind: input, shape index: {}]   ;;  %s5522_s16 = inlined_call_operand.vmem [shape: f32[2,64,32], index: 16, kind: input, shape index: {}]   ;;  %s5523_s15 = inlined_call_operand.vmem [shape: f32[2,1,64], index: 15, kind: input, shape index: {}]   ;;  %s5524_s17 = inlined_call_operand.vmem [shape: f32[2,1,32], index: 17, kind: input, shape index: {}]   ;;  %s5525_s18 = inlined_call_operand.vmem [shape: f32[1,32], index: 18, kind: input, shape index: {}]   ;;  %s5526_s19 = inlined_call_operand.vmem [shape: f32[1,32], index: 19, kind: input, shape index: {}]   ;;  %s5527_s20 = inlined_call_operand.vmem [shape: f32[10,32], index: 20, kind: output, shape index: {}]  }
   0x1   :  { %5529 = sst [smem:[#allocation2_spill]] %s5507_s2  ;;  %4510 = vmatprep.subr.bf16.mxu0 %v4702_v0  ;;  %4243 = vmatprep.mubr.msk.f32.mxu0 %vm4703_vm0, %v4704_v4  ;;  %v157_v12 = vlaneseq  ;;  %v153_v19 = vld [vmem:[%s5512_s1] sm:$0xff]  ;;  %vm176_vm2 = vcmask 1040384   ;;  %vm178_vm3 = vcmask 1044480   ;;  %vm180_vm4 = vcmask 1045504   ;;  %v230_v45 = vld [vmem:[%s5513_s8 + $0x8] sm:$0xff] }
   0x2   :  { %5530 = sst [smem:[#allocation3_spill]] %s5508_s0  ;;  %s5534_s23 = sld [smem:[#allocation2_spill]]  ;;  %4257 = vmatprep.subr.mxu1 %v4704_v4  ;;  %4259 = vmatprep.mubr.msk.f32.mxu1 %vm4703_vm0, %v4704_v4  ;;  %vm184_vm5 = vcmask 261120   ;;  %vm188_vm6 = vcmask 254976   ;;  %v229_v44 = vld [vmem:[%s5513_s8] sm:$0xff]  ;;  %v231_v46 = vld [vmem:[%s5513_s8 + $0x10] sm:$0xff] }
   0x3   :  { %5531 = sst [smem:[#allocation4_spill]] %s5509_s3  ;;  %s5535_s0 = sld [smem:[#allocation3_spill]]  ;;  %v158_v13 = vshrl.u32 %v157_v12, 7  ;;  %v4519_v47 = vpack.c.bf16 %v230_v45, %v229_v44  ;;  %v232_v48 = vld [vmem:[%s5513_s8 + $0x18] sm:$0xff]  ;;  %v3978_v57 = vld [vmem:[%s5514_s6] ss:$0 sm:$0xff] }
   0x4   :  { %5532 = sst [smem:[#allocation5_spill]] %s5510_s5  ;;  %s5536_s3 = sld [smem:[#allocation4_spill]]  ;;  %v4523_v49 = vpack.c.bf16 %v232_v48, %v231_v46  ;;  %v3979_v59 = vld [vmem:[%s5515_s7] ss:$0 sm:$0xff]  ;;  %vm330_vm7 = vcmask 64512   ;;  %vm637_vm8 = vcmask 36864  }
   0x5   :  { %5533 = sst [smem:[#allocation6_spill]] %s5511_s4  ;;  %v159_v14 = vsub.s32 0, %v158_v13  ;;  %s4705_s4 = smov 112   ;;  %vm1015_vm9 = vcmask 1042432   ;;  %vm684_vm10 = vcmask 39936   ;;  %vm1004_vm11 = vcmask 130048  }
   0x6   :  { %s5538_s28 = sld [smem:[#allocation6_spill]]  ;;  %s4707_s1 = smov 104   ;;  %vm1006_vm12 = vcmask 195584   ;;  %vm1969_vm13 = vcmask 523264  }
   0x7   :  { %s4709_s2 = smov 64   ;;  %s4710_s21 = smov 8  }
   0x8   :  { %v66_v1 = vld [vmem:[%s5534_s23] sm:$0xff]  ;;  %v67_v2 = vld [vmem:[%s5534_s23 + $0x8] sm:$0xff]  ;;  %v68_v3 = vld [vmem:[%s5534_s23 + $0x10] sm:$0xff]  ;;  %s4711_s27 = smov 16  }
   0x9   :  { %v4511_v5 = vpack.c.bf16 %v67_v2, %v66_v1  ;;  %v69_v6 = vld [vmem:[%s5534_s23 + $0x18] sm:$0xff]  ;;  %v70_v8 = vld [vmem:[%s5534_s23 + $0x20] sm:$0xff]  ;;  %v71_v9 = vld [vmem:[%s5534_s23 + $0x28] sm:$0xff]  ;;  %s5537_s23 = sld [smem:[#allocation5_spill]] }
   0xa   :  { %v4514_v7 = vpack.c.bf16 %v69_v6, %v68_v3  ;;  %v4517_v10 = vpack.c.bf16 %v71_v9, %v70_v8  ;;  %v65_v11 = vld [vmem:[%s5535_s0] sm:$0xff] }
   0xb   :  { %4512 = vmatpush3.bf16.msra.mxu0 %v4511_v5  ;;  %v3976_v15 = vld [vmem:[%s5536_s3] ss:$0 sm:$0xff] }
   0xc   :  { %4513 = vmatprep.subr.bf16.mxu0 %v4702_v0  ;;  %v163_v17 = vld [vmem:[%s5538_s28] sm:$0x1]  ;;  %s4712_s28 = smov 24  }
   0xd   :  { %v3980_v2 = vld [vmem:[%s5516_s9] ss:$0 sm:$0xff] }
   0xf   :  { %4515 = vmatpush3.bf16.msra.mxu0 %v4514_v7  ;;  %v155_v16 = vld [vmem:[%s5537_s23] sm:$0x1] }
  0x10   :  { %4516 = vmatprep.subr.bf16.mxu0 %v4702_v0  ;;  %v160_v21 = vrot.slane %v155_v16, %v159_v14  ;;  %v164_v23 = vadd.f32 %v163_v17, %v155_v16 }
  0x12   :  { %v172_v26 = vrot.slane %v164_v23, %v159_v14 }
  0x13   :  { %4518 = vmatpush3.bf16.msra.mxu0 %v4517_v10 }
  0x14   :  { %4520 = vmatprep.subr.bf16.mxu0 %v4519_v47 }
  0x16   :  { %4244 = vmatmul.mubr.msk.f32.vlgmr.msra.gmra.mrb[0].mxu0 %vm79_vm1, %v65_v11 }
  0x17   :  { %4522 = vmatpush3.bf16.msra.mxu0 %v4519_v47 }
  0x18   :  { %4524 = vmatprep.subr.bf16.mxu0 %v4523_v49 }
  0x1b   :  { %4526 = vmatpush3.bf16.msra.mxu0 %v4523_v49 }
  0x1c   :  { %4262 = vmatprep.subr.mxu0 %v4704_v4 }
  0xe9   :  { %v149_v18 = vpop.f32.mrb[0].mxu0 }
  0xea   :  { %v150_v20 = vadd.f32 %v3976_v15, %v149_v18  ;;  %v4245_v22 = vpop.f32.mrb[1].mxu0 }
  0xec   :  { %v154_v24 = vadd.f32 %v153_v19, %v150_v20 }
  0xee   :  { %v162_v25 = vadd.f32 %v160_v21, %v154_v24 }
  0xf0   :  { %v166_v27 = vrot.slane %v162_v25, 7  ;;  %v4856_v28 = vrot.slane %v162_v25, 6 }
  0xf2   :  { %v177_v29 = vsel %vm176_vm2, %v164_v23, %v166_v27  ;;  %v189_v33 = vsel %vm188_vm6, %v4856_v28, 0.0 }
  0xf3   :  { %v179_v30 = vsel %vm178_vm3, %v177_v29, %v172_v26 }
  0xf4   :  { %v4860_v31 = vsel %vm180_vm4, %v179_v30, %v4856_v28 }
  0xf5   :  { %v185_v32 = vsel %vm184_vm5, %v4860_v31, 0.0 }
  0xf6   :  { %186 = vadd.xlane.f32.xlu0 %v185_v32 }
  0xfa   :  { %190 = vadd.xlane.f32.xlu0 %v189_v33 }
 0x183   :  { %v187_v34 = vpop.xlane.xlu0 %186 }
 0x184   :  { %v193_v35 = vmul.f32 0.03125, %v187_v34 }
 0x186   :  { %v195_v36 = vsub.f32 %v4860_v31, %v193_v35 }
 0x187   :  { %v191_v37 = vpop.xlane.xlu0 %190 }
 0x188   :  { %v194_v38 = vmul.f32 0.03125, %v191_v37  ;;  %v197_v39 = vmul.f32 %v195_v36, %v195_v36 }
 0x18a   :  { %v196_v40 = vsub.f32 %v4856_v28, %v194_v38  ;;  %v199_v41 = vsel %vm184_vm5, %v197_v39, 0.0 }
 0x18b   :  { %200 = vadd.xlane.f32.xlu1 %v199_v41 }
 0x18c   :  { %v198_v42 = vmul.f32 %v196_v40, %v196_v40 }
 0x18e   :  { %v202_v43 = vsel %vm188_vm6, %v198_v42, 0.0 }
 0x18f   :  { %203 = vadd.xlane.f32.xlu1 %v202_v43 }
 0x218   :  { %v201_v50 = vpop.xlane.xlu1 %200 }
 0x219   :  { %v205_v51 = vmul.f32 0.03125, %v201_v50 }
 0x21b   :  { %v207_v52 = vadd.f32 1e-05, %v205_v51 }
 0x21c   :  { %v204_v53 = vpop.xlane.xlu1 %203 }
 0x21d   :  { %4610 = vrsqrt.f32 %v207_v52  ;;  %v206_v54 = vmul.f32 0.03125, %v204_v53 }
 0x21f   :  { %v208_v55 = vadd.f32 1e-05, %v206_v54 }
 0x221   :  { %4612 = vrsqrt.f32 %v208_v55 }
 0x227   :  { %v4611_v56 = vpop.eup %4610 }
 0x228   :  { %v211_v58 = vmul.f32 %v4611_v56, %v195_v36 }
 0x22a   :  { %v219_v60 = vmul.f32 %v3978_v57, %v211_v58 }
 0x22b   :  { %v4613_v61 = vpop.eup %4612 }
 0x22c   :  { %v212_v62 = vmul.f32 %v4613_v61, %v196_v40  ;;  %v227_v63 = vadd.f32 %v3979_v59, %v219_v60 }
 0x22e   :  { %v220_v0 = vmul.f32 %v3978_v57, %v212_v62  ;;  %4254 = vmatprep.mubr.msk.f32.mxu0 %vm184_vm5, %v227_v63 }
 0x230   :  { %v228_v1 = vadd.f32 %v3979_v59, %v220_v0 }
 0x232   :  { %4255 = vmatmul.mubr.msk.f32.vlgmr.msra.gmra.mrb[2].mxu0 %vm184_vm5, %v228_v1 }
 0x233   :  { %4264 = vmatprep.mubr.msk.f32.mxu0 %vm4703_vm0, %v4704_v4 }
 0x305   :  { %v4256_v3 = vpop.f32.mrb[2].mxu0 }
 0x306   :  { %v4896_v5 = vadd.f32 %v4256_v3, %v3980_v2  ;;  %v312_v6 = vpop.f32.mrb[3].mxu0 }
 0x307   :  { %v4898_v7 = vadd.f32 %v3980_v2, %v312_v6 }
 0x308   :  { %v1017_v63 = vrot.slane %v4896_v5, 5 }
 0x309   :  { %324 = vrot.lane.b32.xlu1 %v4898_v7, %s4705_s4  ;;  %322 = vrot.lane.b32.xlu0 %v4898_v7, %s4706_s29  ;;  %v1016_v62 = vrot.slane %v4898_v7, 5 }
 0x30b   :  { %v4985_v6 = vsel %vm1015_vm9, %v1016_v62, %v1017_v63 }
 0x30d   :  { %326 = vrot.lane.b32.xlu1 %v4898_v7, %s4707_s1 }
 0x311   :  { %328 = vrot.lane.b32.xlu1 %v4898_v7, %s4708_s30 }
 0x37b   :  { %v4908_v8 = vpop.permute.xlu1 %324  ;;  %v4910_v9 = vpop.permute.xlu0 %322 }
 0x37c   :  { %481 = vrot.lane.b32.xlu1 %v4908_v8, %s4708_s30  ;;  %405 = vrot.lane.b32.xlu0 %v4910_v9, %s4708_s30  ;;  %v1095_v42 = vrot.slane %v4910_v9, 5 }
 0x37f   :  { %v4916_v10 = vpop.permute.xlu1 %326 }
 0x380   :  { %557 = vrot.lane.b32.xlu0 %v4916_v10, %s4708_s30  ;;  %v1253_v0 = vrot.slane %v4916_v10, 5 }
 0x383   :  { %v329_v11 = vpop.permute.xlu1 %328 }
 0x384   :  { %4258 = vmatpush3.xpose.msk.msra.mxu1 %vm330_vm7, %v329_v11 }
 0x385   :  { %4267 = vmatprep.subr.mxu1 %v4704_v4 }
 0x387   :  { %4260 = vmatmul.mubr.msk.f32.vlgmr.msra.gmra.mrb[0].mxu1 %vm330_vm7, %v4898_v7 }
 0x388   :  { %4269 = vmatprep.mubr.msk.f32.mxu1 %vm4703_vm0, %v4704_v4 }
 0x3ee   :  { %v482_v12 = vpop.permute.xlu1 %481  ;;  %v406_v13 = vpop.permute.xlu0 %405 }
 0x3ef   :  { %4263 = vmatpush3.xpose.msk.msra.mxu0 %vm330_vm7, %v406_v13  ;;  %4268 = vmatpush3.xpose.msk.msra.mxu1 %vm330_vm7, %v482_v12 }
 0x3f0   :  { %4272 = vmatprep.subr.mxu0 %v4704_v4  ;;  %4277 = vmatprep.subr.mxu1 %v4704_v4 }
 0x3f2   :  { %4265 = vmatmul.mubr.msk.f32.vlgmr.msra.gmra.mrb[4].mxu0 %vm330_vm7, %v4910_v9  ;;  %4270 = vmatmul.mubr.msk.f32.vlgmr.msra.gmra.mrb[2].mxu1 %vm330_vm7, %v4908_v8  ;;  %v558_v14 = vpop.permute.xlu0 %557 }
 0x3f3   :  { %4273 = vmatpush3.xpose.msk.msra.mxu0 %vm330_vm7, %v558_v14  ;;  %4274 = vmatprep.mubr.msk.f32.mxu0 %vm4703_vm0, %v4704_v4 }
 0x3f4   :  { %4282 = vmatprep.subr.mxu0 %v4704_v4  ;;  %4279 = vmatprep.mubr.msk.f32.mxu1 %vm4703_vm0, %v4704_v4 }
 0x3f6   :  { %4275 = vmatmul.mubr.msk.f32.vlgmr.msra.gmra.mrb[6].mxu0 %vm330_vm7, %v4916_v10 }
 0x3f7   :  { %4284 = vmatprep.mubr.msk.f32.mxu0 %vm4703_vm0, %v4704_v4 }
 0x45a   :  { %v401_v15 = vpop.f32.mrb[0].mxu1 }
 0x45b   :  { %v633_v16 = vmul.f32 0.35355338, %v401_v15  ;;  %v4261_v17 = vpop.f32.mrb[1].mxu1 }
 0x45d   :  { %v638_v18 = vsel %vm637_vm8, %v633_v16, -inf }
 0x45e   :  { %639 = vmax.xlane.f32.xlu1 %v638_v18 }
 0x46f   :  { %1009 = vrot.lane.b32.xlu1 %v4896_v5, %s4706_s29 }
 0x473   :  { %1013 = vrot.lane.b32.xlu1 %v4896_v5, %s4707_s1 }
 0x477   :  { %760 = vrot.lane.b32.xlu1 %v4910_v9, %s4709_s2 }
 0x47b   :  { %837 = vrot.lane.b32.xlu1 %v4908_v8, %s4709_s2 }
 0x47f   :  { %914 = vrot.lane.b32.xlu1 %v4916_v10, %s4709_s2 }
 0x4c5   :  { %v477_v19 = vpop.f32.mrb[4].mxu0  ;;  %v553_v20 = vpop.f32.mrb[2].mxu1 }
 0x4c6   :  { %v634_v21 = vmul.f32 0.35355338, %v477_v19  ;;  %v4266_v22 = vpop.f32.mrb[5].mxu0  ;;  %v4271_v23 = vpop.f32.mrb[3].mxu1  ;;  %v635_v24 = vmul.f32 0.35355338, %v553_v20 }
 0x4c8   :  { %v641_v25 = vsel %vm637_vm8, %v634_v21, -inf  ;;  %v644_v30 = vsel %vm637_vm8, %v635_v24, -inf }
 0x4c9   :  { %642 = vmax.xlane.f32.xlu0 %v641_v25  ;;  %v629_v26 = vpop.f32.mrb[6].mxu0 }
 0x4ca   :  { %v4276_v27 = vpop.f32.mrb[7].mxu0  ;;  %v636_v29 = vmul.f32 0.35355338, %v629_v26 }
 0x4cc   :  { %v647_v32 = vsel %vm637_vm8, %v636_v29, -inf }
 0x4cd   :  { %645 = vmax.xlane.f32.xlu0 %v644_v30 }
 0x4d1   :  { %648 = vmax.xlane.f32.xlu0 %v647_v32 }
 0x4e7   :  { %1011 = vrot.lane.b32.xlu0 %v4896_v5, %s4705_s4 }
 0x4eb   :  { %v640_v33 = vpop.xlane.xlu1 %639  ;;  %682 = vrot.lane.b32.xlu0 %v4898_v7, %s4709_s2  ;;  %v1174_v7 = vrot.slane %v4908_v8, 5 }
 0x4ec   :  { %v650_v34 = vsub.f32 %v633_v16, %v640_v33 }
 0x4ee   :  { %v654_v35 = vmul.f32 1.442695, %v650_v34 }
 0x4ef   :  { %v1010_v36 = vpop.permute.xlu1 %1009 }
 0x4f0   :  { %4614 = vpow2.f32 %v654_v35  ;;  %v1096_v41 = vrot.slane %v1010_v36, 5 }
 0x4f2   :  { %v4967_v43 = vsel %vm1015_vm9, %v1095_v42, %v1096_v41 }
 0x4f3   :  { %v1014_v37 = vpop.permute.xlu1 %1013 }
 0x4f4   :  { %v1254_v61 = vrot.slane %v1014_v37, 5 }
 0x4f6   :  { %v4980_v2 = vsel %vm1015_vm9, %v1253_v0, %v1254_v61 }
 0x4f7   :  { %v761_v38 = vpop.permute.xlu1 %760 }
 0x4f8   :  { %4283 = vmatpush3.msk.msra.mxu0 %vm178_vm3, %v761_v38 }
 0x4f9   :  { %4292 = vmatprep.subr.mxu0 %v4704_v4 }
 0x4fa   :  { %v4615_v39 = vpop.eup %4614 }
 0x4fb   :  { %v662_v40 = vsel %vm637_vm8, %v4615_v39, 0.0  ;;  %v838_v1 = vpop.permute.xlu1 %837 }
 0x4fc   :  { %663 = vadd.xlane.f32.xlu1 %v662_v40 }
 0x4ff   :  { %v915_v9 = vpop.permute.xlu1 %914 }
 0x50d   :  { %1098 = vrot.lane.b32.xlu1 %v4967_v43, %s4708_s30 }
 0x556   :  { %v643_v44 = vpop.xlane.xlu0 %642 }
 0x557   :  { %v651_v45 = vsub.f32 %v634_v21, %v643_v44 }
 0x559   :  { %v656_v46 = vmul.f32 1.442695, %v651_v45 }
 0x55a   :  { %v646_v47 = vpop.xlane.xlu0 %645 }
 0x55b   :  { %4616 = vpow2.f32 %v656_v46  ;;  %v652_v48 = vsub.f32 %v635_v24, %v646_v47 }
 0x55d   :  { %v658_v49 = vmul.f32 1.442695, %v652_v48 }
 0x55e   :  { %v649_v50 = vpop.xlane.xlu0 %648 }
 0x55f   :  { %4618 = vpow2.f32 %v658_v49  ;;  %v653_v51 = vsub.f32 %v636_v29, %v649_v50 }
 0x561   :  { %v660_v52 = vmul.f32 1.442695, %v653_v51 }
 0x562   :  { %v1012_v53 = vpop.permute.xlu0 %1011 }
 0x563   :  { %4620 = vpow2.f32 %v660_v52  ;;  %v1175_v3 = vrot.slane %v1012_v53, 5 }
 0x565   :  { %v4617_v54 = vpop.eup %4616  ;;  %v4991_v5 = vsel %vm1015_vm9, %v1174_v7, %v1175_v3 }
 0x566   :  { %v683_v55 = vpop.permute.xlu0 %682  ;;  %v665_v56 = vsel %vm637_vm8, %v4617_v54, 0.0 }
 0x567   :  { %666 = vadd.xlane.f32.xlu0 %v665_v56  ;;  %4278 = vmatpush3.msk.msra.mxu1 %vm178_vm3, %v683_v55 }
 0x568   :  { %4287 = vmatprep.subr.mxu1 %v4704_v4 }
 0x569   :  { %v4619_v57 = vpop.eup %4618 }
 0x56a   :  { %v668_v58 = vsel %vm637_vm8, %v4619_v57, 0.0 }
 0x56b   :  { %669 = vadd.xlane.f32.xlu0 %v668_v58 }
 0x56d   :  { %v4621_v59 = vpop.eup %4620 }
 0x56e   :  { %v671_v60 = vsel %vm637_vm8, %v4621_v59, 0.0 }
 0x56f   :  { %672 = vadd.xlane.f32.xlu1 %v671_v60 }
 0x580   :  { %1256 = vrot.lane.b32.xlu1 %v4980_v2, %s4708_s30 }
 0x581   :  { %1019 = vrot.lane.b32.xlu0 %v4985_v6, %s4708_s30 }
 0x585   :  { %1177 = vrot.lane.b32.xlu0 %v4991_v5, %s4708_s30 }
 0x589   :  { %v664_v10 = vpop.xlane.xlu1 %663 }
 0x58a   :  { %4622 = vrcp.f32 %v664_v10 }
 0x58d   :  { %v1099_v13 = vpop.permute.xlu1 %1098 }
 0x594   :  { %v4623_v11 = vpop.eup %4622 }
 0x595   :  { %v675_v12 = vmul.f32 %v4623_v11, %v4615_v39 }
 0x597   :  { %4280 = vmatmul.mubr.msk.f32.vlgmr.msra.gmra.mrb[4].mxu1 %vm684_vm10, %v675_v12 }
 0x598   :  { %4288 = vmatpush3.msk.msra.mxu1 %vm178_vm3, %v838_v1  ;;  %4289 = vmatprep.mubr.msk.f32.mxu1 %vm4703_vm0, %v4704_v4 }
 0x599   :  { %4297 = vmatprep.subr.mxu1 %v4704_v4 }
 0x5f4   :  { %v667_v8 = vpop.xlane.xlu0 %666 }
 0x5f5   :  { %4624 = vrcp.f32 %v667_v8 }
 0x5f8   :  { %v670_v14 = vpop.xlane.xlu0 %669 }
 0x5f9   :  { %4626 = vrcp.f32 %v670_v14 }
 0x5fc   :  { %v673_v15 = vpop.xlane.xlu1 %672  ;;  %v1020_v20 = vpop.permute.xlu0 %1019 }
 0x5fd   :  { %4628 = vrcp.f32 %v673_v15 }
 0x5ff   :  { %v4625_v16 = vpop.eup %4624 }
 0x600   :  { %v677_v17 = vmul.f32 %v4625_v16, %v4617_v54  ;;  %v1178_v23 = vpop.permute.xlu0 %1177  ;;  %v1257_v24 = vpop.permute.xlu1 %1256 }
 0x602   :  { %4285 = vmatmul.mubr.msk.f32.vlgmr.msra.gmra.mrb[8].mxu0 %vm684_vm10, %v677_v17 }
 0x603   :  { %v4627_v18 = vpop.eup %4626  ;;  %4293 = vmatpush3.msk.msra.mxu0 %vm178_vm3, %v915_v9  ;;  %4294 = vmatprep.mubr.msk.f32.mxu0 %vm4703_vm0, %v4704_v4 }
 0x604   :  { %v679_v19 = vmul.f32 %v4627_v18, %v4619_v57  ;;  %4302 = vmatprep.subr.mxu0 %v4704_v4 }
 0x606   :  { %4290 = vmatmul.mubr.msk.f32.vlgmr.msra.gmra.mrb[6].mxu1 %vm684_vm10, %v679_v19 }
 0x607   :  { %v4629_v21 = vpop.eup %4628  ;;  %4298 = vmatpush3.xpose.msk.msra.mxu1 %vm330_vm7, %v1020_v20  ;;  %4299 = vmatprep.mubr.msk.f32.mxu1 %vm4703_vm0, %v4704_v4 }
 0x608   :  { %v681_v22 = vmul.f32 %v4629_v21, %v4621_v59  ;;  %4307 = vmatprep.subr.mxu1 %v4704_v4 }
 0x60a   :  { %4295 = vmatmul.mubr.msk.f32.vlgmr.msra.gmra.mrb[10].mxu0 %vm684_vm10, %v681_v22  ;;  %4300 = vmatmul.mubr.msk.f32.vlgmr.msra.gmra.mrb[8].mxu1 %vm330_vm7, %v4985_v6 }
 0x60b   :  { %4303 = vmatpush3.xpose.msk.msra.mxu0 %vm330_vm7, %v1099_v13  ;;  %4308 = vmatpush3.xpose.msk.msra.mxu1 %vm330_vm7, %v1178_v23 }
 0x60c   :  { %4304 = vmatprep.mubr.msk.f32.mxu0 %vm4703_vm0, %v4704_v4  ;;  %4309 = vmatprep.mubr.msk.f32.mxu1 %vm4703_vm0, %v4704_v4 }
 0x60d   :  { %4312 = vmatprep.subr.mxu0 %v4704_v4  ;;  %4317 = vmatprep.subr.mxu1 %v4704_v4 }
 0x60e   :  { %4305 = vmatmul.mubr.msk.f32.vlgmr.msra.gmra.mrb[12].mxu0 %vm330_vm7, %v4967_v43  ;;  %4310 = vmatmul.mubr.msk.f32.vlgmr.msra.gmra.mrb[10].mxu1 %vm330_vm7, %v4991_v5 }
 0x60f   :  { %4313 = vmatpush3.xpose.msk.msra.mxu0 %vm330_vm7, %v1257_v24  ;;  %4314 = vmatprep.mubr.msk.f32.mxu0 %vm4703_vm0, %v4704_v4  ;;  %v1707_v24 = vld [vmem:[%s5517_s10] sm:$0xff] }
 0x610   :  { %4322 = vmatprep.subr.mxu0 %v4704_v4  ;;  %4319 = vmatprep.mubr.msk.f32.mxu1 %vm4703_vm0, %v4704_v4 }
 0x612   :  { %4315 = vmatmul.mubr.msk.f32.vlgmr.msra.gmra.mrb[14].mxu0 %vm330_vm7, %v4980_v2 }
 0x613   :  { %4324 = vmatprep.mubr.msk.f32.mxu0 %vm4703_vm0, %v4704_v4 }
 0x66a   :  { %v5035_v25 = vpop.f32.mrb[4].mxu1 }
 0x66b   :  { %v4281_v26 = vpop.f32.mrb[5].mxu1 }
 0x66c   :  { %v1708_v26 = vld [vmem:[%s5517_s10 + $0x8] sm:$0xff] }
 0x6d5   :  { %v833_v27 = vpop.f32.mrb[8].mxu0 }
 0x6d6   :  { %v4286_v29 = vpop.f32.mrb[9].mxu0 }
 0x6d7   :  { %v1709_v29 = vld [vmem:[%s5517_s10 + $0x10] sm:$0xff] }
 0x6d9   :  { %v5037_v30 = vpop.f32.mrb[6].mxu1 }
 0x6da   :  { %v4291_v32 = vpop.f32.mrb[7].mxu1 }
 0x6db   :  { %v1710_v32 = vld [vmem:[%s5517_s10 + $0x18] sm:$0xff] }
 0x6dd   :  { %v5039_v33 = vpop.f32.mrb[10].mxu0  ;;  %v1091_v34 = vpop.f32.mrb[8].mxu1 }
 0x6de   :  { %v1332_v35 = vmul.f32 0.35355338, %v1091_v34  ;;  %v4296_v36 = vpop.f32.mrb[11].mxu0  ;;  %v4301_v37 = vpop.f32.mrb[9].mxu1  ;;  %v4531_v34 = vpack.c.bf16 %v1710_v32, %v1709_v29 }
 0x6e0   :  { %v1336_v38 = vsel %vm637_vm8, %v1332_v35, -inf }
 0x6e1   :  { %v1170_v39 = vpop.f32.mrb[12].mxu0  ;;  %1337 = vmax.xlane.f32.xlu0 %v1336_v38  ;;  %v1249_v40 = vpop.f32.mrb[10].mxu1 }
 0x6e2   :  { %v1333_v41 = vmul.f32 0.35355338, %v1170_v39  ;;  %v1334_v42 = vmul.f32 0.35355338, %v1249_v40  ;;  %v4306_v44 = vpop.f32.mrb[13].mxu0  ;;  %v4311_v45 = vpop.f32.mrb[11].mxu1 }
 0x6e4   :  { %v1339_v46 = vsel %vm637_vm8, %v1333_v41, -inf  ;;  %v1342_v47 = vsel %vm637_vm8, %v1334_v42, -inf }
 0x6e5   :  { %1340 = vmax.xlane.f32.xlu1 %v1339_v46  ;;  %v1328_v48 = vpop.f32.mrb[14].mxu0  ;;  %1343 = vmax.xlane.f32.xlu0 %v1342_v47 }
 0x6e6   :  { %v1335_v49 = vmul.f32 0.35355338, %v1328_v48  ;;  %v4316_v50 = vpop.f32.mrb[15].mxu0 }
 0x6e8   :  { %v1345_v51 = vsel %vm637_vm8, %v1335_v49, -inf }
 0x6e9   :  { %1346 = vmax.xlane.f32.xlu0 %v1345_v51 }
 0x6f6   :  { %1457 = vrot.lane.b32.xlu1 %v4967_v43, %s4709_s2 }
 0x6fa   :  { %1534 = vrot.lane.b32.xlu1 %v4991_v5, %s4709_s2 }
 0x76e   :  { %v1338_v52 = vpop.xlane.xlu0 %1337 }
 0x76f   :  { %v1348_v53 = vsub.f32 %v1332_v35, %v1338_v52 }
 0x771   :  { %v1352_v54 = vmul.f32 1.442695, %v1348_v53 }
 0x772   :  { %v1341_v55 = vpop.xlane.xlu1 %1340  ;;  %v1344_v56 = vpop.xlane.xlu0 %1343 }
 0x773   :  { %4630 = vpow2.f32 %v1352_v54  ;;  %v1349_v57 = vsub.f32 %v1333_v41, %v1341_v55  ;;  %v1350_v58 = vsub.f32 %v1334_v42, %v1344_v56  ;;  %v4015_v56 = vld [vmem:[%s5518_s11] ss:$0 sm:$0xff] }
 0x775   :  { %v1354_v59 = vmul.f32 1.442695, %v1349_v57  ;;  %v1356_v60 = vmul.f32 1.442695, %v1350_v58 }
 0x776   :  { %v1458_v61 = vpop.permute.xlu1 %1457  ;;  %v1347_v62 = vpop.xlane.xlu0 %1346 }
 0x777   :  { %4632 = vpow2.f32 %v1354_v59  ;;  %v1351_v63 = vsub.f32 %v1335_v49, %v1347_v62  ;;  %4323 = vmatpush3.msk.msra.mxu0 %vm178_vm3, %v1458_v61 }
 0x778   :  { %4634 = vpow2.f32 %v1356_v60  ;;  %4332 = vmatprep.subr.mxu0 %v4704_v4 }
 0x779   :  { %v1358_v43 = vmul.f32 1.442695, %v1351_v63 }
 0x77a   :  { %v1535_v12 = vpop.permute.xlu1 %1534 }
 0x77b   :  { %4636 = vpow2.f32 %v1358_v43 }
 0x77d   :  { %v4631_v0 = vpop.eup %4630 }
 0x77e   :  { %v1360_v1 = vsel %vm637_vm8, %v4631_v0, 0.0 }
 0x77f   :  { %1361 = vadd.xlane.f32.xlu0 %v1360_v1 }
 0x781   :  { %v4633_v3 = vpop.eup %4632 }
 0x782   :  { %v4635_v7 = vpop.eup %4634  ;;  %v1363_v5 = vsel %vm637_vm8, %v4633_v3, 0.0 }
 0x783   :  { %1364 = vadd.xlane.f32.xlu1 %v1363_v5  ;;  %v1366_v9 = vsel %vm637_vm8, %v4635_v7, 0.0 }
 0x784   :  { %1367 = vadd.xlane.f32.xlu0 %v1366_v9 }
 0x785   :  { %v4637_v10 = vpop.eup %4636 }
 0x786   :  { %v1369_v11 = vsel %vm637_vm8, %v4637_v10, 0.0 }
 0x787   :  { %1370 = vadd.xlane.f32.xlu1 %v1369_v11  ;;  %v1844_v11 = vld [vmem:[%s5519_s14] sm:$0xff] }
 0x798   :  { %1611 = vrot.lane.b32.xlu1 %v4980_v2, %s4709_s2 }
 0x79a   :  { %1380 = vrot.lane.b32.xlu0 %v4985_v6, %s4709_s2 }
 0x79e   :  { %992 = vrot.lane.b32.xlu0 %v833_v27, %s4710_s21  ;;  %v4527_v27 = vpack.c.bf16 %v1708_v26, %v1707_v24 }
 0x80c   :  { %v1362_v8 = vpop.xlane.xlu0 %1361 }
 0x80d   :  { %4638 = vrcp.f32 %v1362_v8 }
 0x810   :  { %v1365_v13 = vpop.xlane.xlu1 %1364 }
 0x811   :  { %4640 = vrcp.f32 %v1365_v13  ;;  %v1368_v14 = vpop.xlane.xlu0 %1367  ;;  %v1846_v13 = vld [vmem:[%s5519_s14 + $0x10] sm:$0xff] }
 0x812   :  { %4642 = vrcp.f32 %v1368_v14  ;;  %v1847_v14 = vld [vmem:[%s5519_s14 + $0x18] sm:$0xff] }
 0x814   :  { %v1371_v15 = vpop.xlane.xlu1 %1370 }
 0x815   :  { %4644 = vrcp.f32 %v1371_v15  ;;  %v1381_v16 = vpop.permute.xlu0 %1380  ;;  %v4539_v15 = vpack.c.bf16 %v1847_v14, %v1846_v13 }
 0x816   :  { %4318 = vmatpush3.msk.msra.mxu1 %vm178_vm3, %v1381_v16 }
 0x817   :  { %v4639_v17 = vpop.eup %4638  ;;  %4327 = vmatprep.subr.mxu1 %v4704_v4 }
 0x818   :  { %v1373_v2 = vmul.f32 %v4639_v17, %v4631_v0  ;;  %v1612_v21 = vpop.permute.xlu1 %1611 }
 0x819   :  { %v993_v44 = vpop.permute.xlu0 %992 }
 0x81a   :  { %4320 = vmatmul.mubr.msk.f32.vlgmr.msra.gmra.mrb[12].mxu1 %vm684_vm10, %v1373_v2  ;;  %v1003_v51 = vsel %vm330_vm7, %v5035_v25, %v993_v44 }
 0x81b   :  { %v4641_v6 = vpop.eup %4640  ;;  %4328 = vmatpush3.msk.msra.mxu1 %vm178_vm3, %v1535_v12  ;;  %4329 = vmatprep.mubr.msk.f32.mxu1 %vm4703_vm0, %v4704_v4  ;;  %v1845_v12 = vld [vmem:[%s5519_s14 + $0x8] sm:$0xff] }
 0x81c   :  { %v4643_v18 = vpop.eup %4642  ;;  %v1375_v19 = vmul.f32 %v4641_v6, %v4633_v3  ;;  %4528 = vmatprep.subr.bf16.mxu1 %v4527_v27  ;;  %v4535_v8 = vpack.c.bf16 %v1845_v12, %v1844_v11 }
 0x81d   :  { %v1377_v20 = vmul.f32 %v4643_v18, %v4635_v7 }
 0x81e   :  { %4325 = vmatmul.mubr.msk.f32.vlgmr.msra.gmra.mrb[16].mxu0 %vm684_vm10, %v1375_v19 }
 0x81f   :  { %v4645_v22 = vpop.eup %4644  ;;  %4330 = vmatmul.mubr.msk.f32.vlgmr.msra.gmra.mrb[14].mxu1 %vm684_vm10, %v1377_v20  ;;  %4333 = vmatpush3.msk.msra.mxu0 %vm178_vm3, %v1612_v21  ;;  %v4018_v21 = vld [vmem:[%s5520_s12] ss:$0 sm:$0xff] }
 0x820   :  { %v1379_v23 = vmul.f32 %v4645_v22, %v4637_v10  ;;  %4334 = vmatprep.mubr.msk.f32.mxu0 %vm4703_vm0, %v4704_v4  ;;  %4530 = vmatpush3.bf16.msra.mxu1 %v4527_v27 }
 0x821   :  { %4532 = vmatprep.subr.bf16.mxu1 %v4531_v34  ;;  %4536 = vmatprep.subr.bf16.mxu0 %v4535_v8 }
 0x822   :  { %4335 = vmatmul.mubr.msk.f32.vlgmr.msra.gmra.mrb[18].mxu0 %vm684_vm10, %v1379_v23  ;;  %v4019_v23 = vld [vmem:[%s5521_s13] ss:$0 sm:$0xff] }
 0x823   :  { %4538 = vmatpush3.bf16.msra.mxu0 %v4535_v8 }
 0x824   :  { %4534 = vmatpush3.bf16.msra.mxu1 %v4531_v34  ;;  %4540 = vmatprep.subr.bf16.mxu0 %v4539_v15 }
 0x827   :  { %4542 = vmatpush3.bf16.msra.mxu0 %v4539_v15 }
 0x8ed   :  { %v1453_v35 = vpop.f32.mrb[12].mxu1 }
 0x8ee   :  { %v4321_v36 = vpop.f32.mrb[13].mxu1 }
 0x8ef   :  { %v1955_v36 = vld [vmem:[%s5522_s16 + $0x8] sm:$0xff] }
 0x8f1   :  { %v1530_v37 = vpop.f32.mrb[16].mxu0 }
 0x8f2   :  { %v1607_v38 = vpop.f32.mrb[14].mxu1  ;;  %v4326_v39 = vpop.f32.mrb[17].mxu0  ;;  %1689 = vrot.lane.b32.xlu0 %v1530_v37, %s4710_s21 }
 0x8f3   :  { %1693 = vrot.lane.b32.xlu1 %v1607_v38, %s4711_s27  ;;  %v4331_v40 = vpop.f32.mrb[15].mxu1  ;;  %v1956_v38 = vld [vmem:[%s5522_s16 + $0x10] sm:$0xff]  ;;  %v1957_v39 = vld [vmem:[%s5522_s16 + $0x18] sm:$0xff] }
 0x8f4   :  { %v4547_v40 = vpack.c.bf16 %v1957_v39, %v1956_v38  ;;  %v4028_v39 = vld [vmem:[%s5514_s6 + $0x1] ss:$0 sm:$0xff] }
 0x8f5   :  { %v1684_v41 = vpop.f32.mrb[18].mxu0 }
 0x8f6   :  { %996 = vrot.lane.b32.xlu0 %v5037_v30, %s4711_s27  ;;  %v4336_v42 = vpop.f32.mrb[19].mxu0 }
 0x8f7   :  { %1697 = vrot.lane.b32.xlu1 %v1684_v41, %s4712_s28  ;;  %v1958_v41 = vld [vmem:[%s5522_s16 + $0x20] sm:$0xff]  ;;  %v1959_v42 = vld [vmem:[%s5522_s16 + $0x28] sm:$0xff] }
 0x8f8   :  { %v4551_v44 = vpack.c.bf16 %v1959_v42, %v1958_v41 }
 0x8fb   :  { %1000 = vrot.lane.b32.xlu1 %v5039_v33, %s4712_s28 }
 0x964   :  { %v1690_v45 = vpop.permute.xlu0 %1689 }
 0x965   :  { %v1694_v46 = vpop.permute.xlu1 %1693  ;;  %v1700_v47 = vsel %vm330_vm7, %v1453_v35, %v1690_v45  ;;  %v1954_v35 = vld [vmem:[%s5522_s16] sm:$0xff]  ;;  %v1960_v45 = vld [vmem:[%s5522_s16 + $0x30] sm:$0xff] }
 0x966   :  { %v1701_v49 = vsel %vm1004_vm11, %v1700_v47, %v1694_v46  ;;  %v4543_v37 = vpack.c.bf16 %v1955_v36, %v1954_v35  ;;  %v1961_v46 = vld [vmem:[%s5522_s16 + $0x38] sm:$0xff] }
 0x967   :  { %v4555_v47 = vpack.c.bf16 %v1961_v46, %v1960_v45 }
 0x968   :  { %v997_v30 = vpop.permute.xlu0 %996  ;;  %4544 = vmatprep.subr.bf16.mxu1 %v4543_v37 }
 0x969   :  { %v1698_v48 = vpop.permute.xlu1 %1697  ;;  %v1005_v53 = vsel %vm1004_vm11, %v1003_v51, %v997_v30 }
 0x96a   :  { %v1702_v50 = vsel %vm1006_vm12, %v1701_v49, %v1698_v48  ;;  %v4020_v48 = vld [vmem:[%s5523_s15] ss:$0 sm:$0xff] }
 0x96b   :  { %v1704_v52 = vrot.slane %v1702_v50, 3 }
 0x96d   :  { %v1001_v33 = vpop.permute.xlu1 %1000 }
 0x96e   :  { %v1007_v54 = vsel %vm1006_vm12, %v1005_v53, %v1001_v33 }
 0x96f   :  { %v1706_v55 = vsel %vm178_vm3, %v1007_v54, %v1704_v52 }
 0x970   :  { %4345 = vmatprep.mubr.msk.f32.mxu1 %vm184_vm5, %v1706_v55 }
 0x971   :  { %4346 = vmatmul.mubr.msk.f32.vlgmr.msra.gmra.mrb[16].mxu1 %vm184_vm5, %v1704_v52 }
 0x972   :  { %4546 = vmatpush3.bf16.msra.mxu1 %v4543_v37 }
 0x973   :  { %4548 = vmatprep.subr.bf16.mxu1 %v4547_v40 }
 0x976   :  { %4550 = vmatpush3.bf16.msra.mxu1 %v4547_v40 }
 0x977   :  { %4552 = vmatprep.subr.bf16.mxu1 %v4551_v44 }
 0x97a   :  { %4554 = vmatpush3.bf16.msra.mxu1 %v4551_v44  ;;  %v4029_v44 = vld [vmem:[%s5515_s7 + $0x1] ss:$0 sm:$0xff] }
 0x97b   :  { %4556 = vmatprep.subr.bf16.mxu1 %v4555_v47 }
 0x97e   :  { %4558 = vmatpush3.bf16.msra.mxu1 %v4555_v47 }
 0x97f   :  { %4399 = vmatprep.subr.mxu1 %v4704_v4 }
 0xa44   :  { %v4347_v57 = vpop.f32.mrb[16].mxu1 }
 0xa45   :  { %v1795_v58 = vadd.f32 %v4347_v57, %v4015_v56  ;;  %v1789_v59 = vpop.f32.mrb[17].mxu1 }
 0xa46   :  { %v1790_v25 = vadd.f32 %v4015_v56, %v1789_v59 }
 0xa47   :  { %v5105_v60 = vadd.f32 %v1795_v58, %v4856_v28 }
 0xa48   :  { %v5108_v61 = vadd.f32 %v1790_v25, %v4860_v31 }
 0xa49   :  { %v1805_v62 = vsel %vm188_vm6, %v5105_v60, 0.0 }
 0xa4a   :  { %1806 = vadd.xlane.f32.xlu1 %v1805_v62  ;;  %v1802_v63 = vsel %vm184_vm5, %v5108_v61, 0.0 }
 0xa4b   :  { %1803 = vadd.xlane.f32.xlu0 %v1802_v63 }
 0xad7   :  { %v1807_v43 = vpop.xlane.xlu1 %1806 }
 0xad8   :  { %v1809_v0 = vmul.f32 0.03125, %v1807_v43  ;;  %v1804_v1 = vpop.xlane.xlu0 %1803 }
 0xad9   :  { %v1808_v3 = vmul.f32 0.03125, %v1804_v1 }
 0xada   :  { %v1811_v7 = vsub.f32 %v5105_v60, %v1809_v0 }
 0xadb   :  { %v1810_v28 = vsub.f32 %v5108_v61, %v1808_v3 }
 0xadc   :  { %v1813_v9 = vmul.f32 %v1811_v7, %v1811_v7 }
 0xadd   :  { %v1812_v5 = vmul.f32 %v1810_v28, %v1810_v28 }
 0xade   :  { %v1817_v10 = vsel %vm188_vm6, %v1813_v9, 0.0 }
 0xadf   :  { %v1814_v31 = vsel %vm184_vm5, %v1812_v5, 0.0  ;;  %v4023_v5 = vld [vmem:[%s5524_s17] ss:$0 sm:$0xff] }
 0xae0   :  { %1815 = vadd.xlane.f32.xlu0 %v1814_v31 }
 0xae4   :  { %1818 = vadd.xlane.f32.xlu0 %v1817_v10 }
 0xb6d   :  { %v1816_v16 = vpop.xlane.xlu0 %1815 }
 0xb6e   :  { %v1820_v17 = vmul.f32 0.03125, %v1816_v16 }
 0xb70   :  { %v1822_v2 = vadd.f32 1e-05, %v1820_v17 }
 0xb71   :  { %v1819_v6 = vpop.xlane.xlu0 %1818 }
 0xb72   :  { %4646 = vrsqrt.f32 %v1822_v2  ;;  %v1821_v18 = vmul.f32 0.03125, %v1819_v6 }
 0xb74   :  { %v1823_v19 = vadd.f32 1e-05, %v1821_v18 }
 0xb76   :  { %4648 = vrsqrt.f32 %v1823_v19 }
 0xb7c   :  { %v4647_v20 = vpop.eup %4646 }
 0xb7d   :  { %v1826_v22 = vmul.f32 %v4647_v20, %v1810_v28 }
 0xb7f   :  { %v1834_v24 = vmul.f32 %v4018_v21, %v1826_v22  ;;  %v4031_v22 = vld [vmem:[%s5513_s8 + $0x28] sm:$0xff] }
 0xb80   :  { %v4649_v26 = vpop.eup %4648 }
 0xb81   :  { %v1827_v27 = vmul.f32 %v4649_v26, %v1811_v7  ;;  %v1842_v29 = vadd.f32 %v4019_v23, %v1834_v24  ;;  %v4032_v24 = vld [vmem:[%s5513_s8 + $0x30] sm:$0xff]  ;;  %v4033_v26 = vld [vmem:[%s5513_s8 + $0x38] sm:$0xff] }
 0xb83   :  { %v1835_v32 = vmul.f32 %v4018_v21, %v1827_v27  ;;  %4356 = vmatprep.mubr.msk.f32.mxu0 %vm184_vm5, %v1842_v29  ;;  %v4030_v21 = vld [vmem:[%s5513_s8 + $0x20] sm:$0xff]  ;;  %v4563_v27 = vpack.c.bf16 %v4033_v26, %v4032_v24 }
 0xb85   :  { %v1843_v34 = vadd.f32 %v4019_v23, %v1835_v32  ;;  %v4559_v23 = vpack.c.bf16 %v4031_v22, %v4030_v21 }
 0xb87   :  { %4357 = vmatmul.mubr.msk.f32.vlgmr.msra.gmra.mrb[20].mxu0 %vm184_vm5, %v1843_v34  ;;  %4560 = vmatprep.subr.bf16.mxu0 %v4559_v23 }
 0xb88   :  { %4562 = vmatpush3.bf16.msra.mxu0 %v4559_v23 }
 0xb89   :  { %4564 = vmatprep.subr.bf16.mxu0 %v4563_v27 }
 0xb8c   :  { %4566 = vmatpush3.bf16.msra.mxu0 %v4563_v27 }
 0xb8d   :  { %4389 = vmatprep.subr.mxu0 %v4704_v4 }
 0xc5a   :  { %v4358_v49 = vpop.f32.mrb[20].mxu0 }
 0xc5b   :  { %v1933_v50 = vadd.f32 %v4358_v49, %v4020_v48  ;;  %v1927_v30 = vpop.f32.mrb[21].mxu0  ;;  %v4035_v49 = vld [vmem:[%s5516_s9 + $0x1] ss:$0 sm:$0xff] }
 0xc5c   :  { %v1928_v51 = vadd.f32 %v4020_v48, %v1927_v30 }
 0xc5d   :  { %v1937_v52 = vmul.f32 %v1933_v50, %v1933_v50 }
 0xc5e   :  { %v1936_v53 = vmul.f32 %v1928_v51, %v1928_v51 }
 0xc5f   :  { %v1939_v33 = vmul.f32 %v1937_v52, %v1933_v50 }
 0xc60   :  { %v1938_v54 = vmul.f32 %v1936_v53, %v1928_v51 }
 0xc61   :  { %v1941_v55 = vmul.f32 0.044715, %v1939_v33 }
 0xc62   :  { %v1940_v56 = vmul.f32 0.044715, %v1938_v54 }
 0xc63   :  { %v1943_v57 = vadd.f32 %v1941_v55, %v1933_v50 }
 0xc64   :  { %v1942_v58 = vadd.f32 %v1940_v56, %v1928_v51 }
 0xc65   :  { %v1945_v59 = vmul.f32 0.7978846, %v1943_v57 }
 0xc66   :  { %v1944_v25 = vmul.f32 0.7978846, %v1942_v58 }
 0xc67   :  { %4650 = vtanh.f32 %v1945_v59 }
 0xc68   :  { %4652 = vtanh.f32 %v1944_v25 }
 0xc71   :  { %v4651_v62 = vpop.eup %4650 }
 0xc72   :  { %v4653_v63 = vpop.eup %4652  ;;  %v1949_v43 = vadd.f32 1.0, %v4651_v62 }
 0xc73   :  { %v1948_v0 = vadd.f32 1.0, %v4653_v63 }
 0xc74   :  { %v1951_v1 = vmul.f32 0.5, %v1949_v43 }
 0xc75   :  { %v1950_v3 = vmul.f32 0.5, %v1948_v0 }
 0xc76   :  { %v1953_v28 = vmul.f32 %v1951_v1, %v1933_v50 }
 0xc77   :  { %v1952_v7 = vmul.f32 %v1950_v3, %v1928_v51 }
 0xc79   :  { %4375 = vmatprep.mubr.msk.f32.mxu1 %vm1969_vm13, %v1952_v7 }
 0xc7a   :  { %4376 = vmatmul.mubr.msk.f32.vlgmr.msra.gmra.mrb[18].mxu1 %vm1969_vm13, %v1953_v28 }
 0xc7b   :  { %4401 = vmatprep.mubr.msk.f32.mxu1 %vm4703_vm0, %v4704_v4 }
 0xd4d   :  { %v4377_v31 = vpop.f32.mrb[18].mxu1 }
 0xd4e   :  { %v2048_v9 = vadd.f32 %v4377_v31, %v4023_v5  ;;  %v2042_v10 = vpop.f32.mrb[19].mxu1 }
 0xd4f   :  { %v2043_v11 = vadd.f32 %v4023_v5, %v2042_v10 }
 0xd50   :  { %v5174_v12 = vadd.f32 %v2048_v9, %v5105_v60 }
 0xd51   :  { %v5177_v8 = vadd.f32 %v2043_v11, %v5108_v61 }
 0xd52   :  { %v2060_v13 = vsel %vm188_vm6, %v5174_v12, 0.0 }
 0xd53   :  { %2061 = vadd.xlane.f32.xlu1 %v2060_v13  ;;  %v2057_v14 = vsel %vm184_vm5, %v5177_v8, 0.0 }
 0xd54   :  { %2058 = vadd.xlane.f32.xlu0 %v2057_v14 }
 0xde0   :  { %v2062_v15 = vpop.xlane.xlu1 %2061 }
 0xde1   :  { %v2064_v16 = vmul.f32 0.03125, %v2062_v15  ;;  %v2059_v17 = vpop.xlane.xlu0 %2058 }
 0xde2   :  { %v2063_v2 = vmul.f32 0.03125, %v2059_v17 }
 0xde3   :  { %v2066_v6 = vsub.f32 %v5174_v12, %v2064_v16 }
 0xde4   :  { %v2065_v60 = vsub.f32 %v5177_v8, %v2063_v2 }
 0xde5   :  { %v2068_v18 = vmul.f32 %v2066_v6, %v2066_v6 }
 0xde6   :  { %v2067_v19 = vmul.f32 %v2065_v60, %v2065_v60 }
 0xde7   :  { %v2072_v61 = vsel %vm188_vm6, %v2068_v18, 0.0 }
 0xde8   :  { %2073 = vadd.xlane.f32.xlu1 %v2072_v61  ;;  %v2069_v20 = vsel %vm184_vm5, %v2067_v19, 0.0 }
 0xde9   :  { %2070 = vadd.xlane.f32.xlu0 %v2069_v20 }
 0xe75   :  { %v2074_v29 = vpop.xlane.xlu1 %2073 }
 0xe76   :  { %v2076_v32 = vmul.f32 0.03125, %v2074_v29  ;;  %v2071_v34 = vpop.xlane.xlu0 %2070 }
 0xe77   :  { %v2075_v35 = vmul.f32 0.03125, %v2071_v34 }
 0xe78   :  { %v2078_v36 = vadd.f32 1e-05, %v2076_v32 }
 0xe79   :  { %v2077_v37 = vadd.f32 1e-05, %v2075_v35 }
 0xe7a   :  { %4654 = vrsqrt.f32 %v2078_v36 }
 0xe7b   :  { %4656 = vrsqrt.f32 %v2077_v37 }
 0xe84   :  { %v4655_v38 = vpop.eup %4654 }
 0xe85   :  { %v4657_v40 = vpop.eup %4656  ;;  %v2082_v41 = vmul.f32 %v4655_v38, %v2066_v6 }
 0xe86   :  { %v2081_v42 = vmul.f32 %v4657_v40, %v2065_v60 }
 0xe87   :  { %v2090_v45 = vmul.f32 %v4028_v39, %v2082_v41 }
 0xe88   :  { %v2089_v46 = vmul.f32 %v4028_v39, %v2081_v42 }
 0xe89   :  { %v2098_v48 = vadd.f32 %v4029_v44, %v2090_v45 }
 0xe8a   :  { %v2097_v47 = vadd.f32 %v4029_v44, %v2089_v46 }
 0xe8c   :  { %4386 = vmatprep.mubr.msk.f32.mxu0 %vm184_vm5, %v2097_v47 }
 0xe8d   :  { %4387 = vmatmul.mubr.msk.f32.vlgmr.msra.gmra.mrb[22].mxu0 %vm184_vm5, %v2098_v48 }
 0xe8e   :  { %4391 = vmatprep.mubr.msk.f32.mxu0 %vm4703_vm0, %v4704_v4 }
 0xf60   :  { %v4388_v50 = vpop.f32.mrb[22].mxu0 }
 0xf61   :  { %v5213_v30 = vadd.f32 %v4388_v50, %v4035_v49  ;;  %v2184_v51 = vpop.f32.mrb[23].mxu0 }
 0xf62   :  { %v5215_v52 = vadd.f32 %v4035_v49, %v2184_v51 }
 0xf63   :  { %v2883_v46 = vrot.slane %v5213_v30, 5 }
 0xf64   :  { %2196 = vrot.lane.b32.xlu1 %v5215_v52, %s4705_s4  ;;  %2194 = vrot.lane.b32.xlu0 %v5215_v52, %s4706_s29  ;;  %v2882_v45 = vrot.slane %v5215_v52, 5 }
 0xf66   :  { %v5302_v51 = vsel %vm1015_vm9, %v2882_v45, %v2883_v46 }
 0xf68   :  { %2198 = vrot.lane.b32.xlu1 %v5215_v52, %s4707_s1 }
 0xf6c   :  { %2200 = vrot.lane.b32.xlu1 %v5215_v52, %s4708_s30 }
 0xfd6   :  { %v5225_v53 = vpop.permute.xlu1 %2196  ;;  %v5227_v33 = vpop.permute.xlu0 %2194 }
 0xfd7   :  { %2352 = vrot.lane.b32.xlu1 %v5225_v53, %s4708_s30  ;;  %2276 = vrot.lane.b32.xlu0 %v5227_v33, %s4708_s30  ;;  %v2961_v61 = vrot.slane %v5227_v33, 5 }
 0xfda   :  { %v5233_v54 = vpop.permute.xlu1 %2198 }
 0xfdb   :  { %2428 = vrot.lane.b32.xlu0 %v5233_v54, %s4708_s30  ;;  %v3119_v47 = vrot.slane %v5233_v54, 5 }
 0xfde   :  { %v2201_v55 = vpop.permute.xlu1 %2200 }
 0xfdf   :  { %4390 = vmatpush3.xpose.msk.msra.mxu0 %vm330_vm7, %v2201_v55 }
 0xfe0   :  { %4394 = vmatprep.subr.mxu0 %v4704_v4 }
 0xfe2   :  { %4392 = vmatmul.mubr.msk.f32.vlgmr.msra.gmra.mrb[24].mxu0 %vm330_vm7, %v5215_v52 }
 0xfe3   :  { %4396 = vmatprep.mubr.msk.f32.mxu0 %vm4703_vm0, %v4704_v4 }
0x1049   :  { %v2353_v56 = vpop.permute.xlu1 %2352  ;;  %v2277_v57 = vpop.permute.xlu0 %2276 }
0x104a   :  { %4395 = vmatpush3.xpose.msk.msra.mxu0 %vm330_vm7, %v2277_v57  ;;  %4400 = vmatpush3.xpose.msk.msra.mxu1 %vm330_vm7, %v2353_v56 }
0x104b   :  { %4404 = vmatprep.subr.mxu0 %v4704_v4  ;;  %4409 = vmatprep.subr.mxu1 %v4704_v4 }
0x104d   :  { %4397 = vmatmul.mubr.msk.f32.vlgmr.msra.gmra.mrb[26].mxu0 %vm330_vm7, %v5227_v33  ;;  %4402 = vmatmul.mubr.msk.f32.vlgmr.msra.gmra.mrb[20].mxu1 %vm330_vm7, %v5225_v53  ;;  %v2429_v58 = vpop.permute.xlu0 %2428 }
0x104e   :  { %4405 = vmatpush3.xpose.msk.msra.mxu0 %vm330_vm7, %v2429_v58  ;;  %4406 = vmatprep.mubr.msk.f32.mxu0 %vm4703_vm0, %v4704_v4 }
0x104f   :  { %4414 = vmatprep.subr.mxu0 %v4704_v4  ;;  %4411 = vmatprep.mubr.msk.f32.mxu1 %vm4703_vm0, %v4704_v4 }
0x1051   :  { %4407 = vmatmul.mubr.msk.f32.vlgmr.msra.gmra.mrb[28].mxu0 %vm330_vm7, %v5233_v54 }
0x1052   :  { %4416 = vmatprep.mubr.msk.f32.mxu0 %vm4703_vm0, %v4704_v4 }
0x10b5   :  { %v2272_v59 = vpop.f32.mrb[24].mxu0 }
0x10b6   :  { %v2504_v25 = vmul.f32 0.35355338, %v2272_v59  ;;  %v4393_v62 = vpop.f32.mrb[25].mxu0 }
0x10b8   :  { %v2508_v63 = vsel %vm637_vm8, %v2504_v25, -inf }
0x10b9   :  { %2509 = vmax.xlane.f32.xlu1 %v2508_v63 }
0x10ca   :  { %2876 = vrot.lane.b32.xlu1 %v5213_v30, %s4706_s29 }
0x10ce   :  { %2880 = vrot.lane.b32.xlu1 %v5213_v30, %s4707_s1 }
0x10d2   :  { %2629 = vrot.lane.b32.xlu1 %v5227_v33, %s4709_s2 }
0x10d6   :  { %2706 = vrot.lane.b32.xlu1 %v5225_v53, %s4709_s2 }
0x10da   :  { %2783 = vrot.lane.b32.xlu1 %v5233_v54, %s4709_s2 }
0x1120   :  { %v2348_v43 = vpop.f32.mrb[26].mxu0  ;;  %v2424_v0 = vpop.f32.mrb[20].mxu1 }
0x1121   :  { %v2505_v1 = vmul.f32 0.35355338, %v2348_v43  ;;  %v4398_v3 = vpop.f32.mrb[27].mxu0  ;;  %v4403_v7 = vpop.f32.mrb[21].mxu1  ;;  %v2506_v28 = vmul.f32 0.35355338, %v2424_v0 }
0x1123   :  { %v2511_v5 = vsel %vm637_vm8, %v2505_v1, -inf  ;;  %v2514_v11 = vsel %vm637_vm8, %v2506_v28, -inf }
0x1124   :  { %2512 = vmax.xlane.f32.xlu0 %v2511_v5  ;;  %v2500_v31 = vpop.f32.mrb[28].mxu0 }
0x1125   :  { %v4408_v9 = vpop.f32.mrb[29].mxu0  ;;  %v2507_v10 = vmul.f32 0.35355338, %v2500_v31 }
0x1127   :  { %v2517_v13 = vsel %vm637_vm8, %v2507_v10, -inf }
0x1128   :  { %2515 = vmax.xlane.f32.xlu0 %v2514_v11 }
0x112c   :  { %2518 = vmax.xlane.f32.xlu0 %v2517_v13 }
0x1142   :  { %2878 = vrot.lane.b32.xlu0 %v5213_v30, %s4705_s4 }
0x1146   :  { %v2510_v14 = vpop.xlane.xlu1 %2509  ;;  %2552 = vrot.lane.b32.xlu0 %v5215_v52, %s4709_s2  ;;  %v3040_v52 = vrot.slane %v5225_v53, 5 }
0x1147   :  { %v2520_v15 = vsub.f32 %v2504_v25, %v2510_v14 }
0x1149   :  { %v2524_v16 = vmul.f32 1.442695, %v2520_v15 }
0x114a   :  { %v2877_v17 = vpop.permute.xlu1 %2876 }
0x114b   :  { %4658 = vpow2.f32 %v2524_v16  ;;  %v2962_v19 = vrot.slane %v2877_v17, 5 }
0x114d   :  { %v5284_v20 = vsel %vm1015_vm9, %v2961_v61, %v2962_v19 }
0x114e   :  { %v2881_v2 = vpop.permute.xlu1 %2880 }
0x114f   :  { %v3120_v44 = vrot.slane %v2881_v2, 5 }
0x1151   :  { %v5297_v49 = vsel %vm1015_vm9, %v3119_v47, %v3120_v44 }
0x1152   :  { %v2630_v6 = vpop.permute.xlu1 %2629 }
0x1153   :  { %4415 = vmatpush3.msk.msra.mxu0 %vm178_vm3, %v2630_v6 }
0x1154   :  { %4424 = vmatprep.subr.mxu0 %v4704_v4 }
0x1155   :  { %v4659_v60 = vpop.eup %4658 }
0x1156   :  { %v2532_v18 = vsel %vm637_vm8, %v4659_v60, 0.0  ;;  %v2707_v48 = vpop.permute.xlu1 %2706 }
0x1157   :  { %2533 = vadd.xlane.f32.xlu1 %v2532_v18 }
0x115a   :  { %v2784_v33 = vpop.permute.xlu1 %2783 }
0x1168   :  { %2964 = vrot.lane.b32.xlu1 %v5284_v20, %s4708_s30 }
0x11b1   :  { %v2513_v21 = vpop.xlane.xlu0 %2512 }
0x11b2   :  { %v2521_v22 = vsub.f32 %v2505_v1, %v2513_v21 }
0x11b4   :  { %v2526_v23 = vmul.f32 1.442695, %v2521_v22 }
0x11b5   :  { %v2516_v24 = vpop.xlane.xlu0 %2515 }
0x11b6   :  { %4660 = vpow2.f32 %v2526_v23  ;;  %v2522_v26 = vsub.f32 %v2506_v28, %v2516_v24 }
0x11b8   :  { %v2528_v27 = vmul.f32 1.442695, %v2522_v26 }
0x11b9   :  { %v2519_v29 = vpop.xlane.xlu0 %2518 }
0x11ba   :  { %4662 = vpow2.f32 %v2528_v27  ;;  %v2523_v32 = vsub.f32 %v2507_v10, %v2519_v29 }
0x11bc   :  { %v2530_v34 = vmul.f32 1.442695, %v2523_v32 }
0x11bd   :  { %v2879_v35 = vpop.permute.xlu0 %2878 }
0x11be   :  { %4664 = vpow2.f32 %v2530_v34  ;;  %v3041_v50 = vrot.slane %v2879_v35, 5 }
0x11c0   :  { %v4661_v36 = vpop.eup %4660  ;;  %v5308_v30 = vsel %vm1015_vm9, %v3040_v52, %v3041_v50 }
0x11c1   :  { %v2553_v37 = vpop.permute.xlu0 %2552  ;;  %v2535_v38 = vsel %vm637_vm8, %v4661_v36, 0.0 }
0x11c2   :  { %2536 = vadd.xlane.f32.xlu0 %v2535_v38  ;;  %4410 = vmatpush3.msk.msra.mxu1 %vm178_vm3, %v2553_v37 }
0x11c3   :  { %4419 = vmatprep.subr.mxu1 %v4704_v4 }
0x11c4   :  { %v4663_v39 = vpop.eup %4662 }
0x11c5   :  { %v2538_v40 = vsel %vm637_vm8, %v4663_v39, 0.0 }
0x11c6   :  { %2539 = vadd.xlane.f32.xlu0 %v2538_v40 }
0x11c8   :  { %v4665_v41 = vpop.eup %4664 }
0x11c9   :  { %v2541_v42 = vsel %vm637_vm8, %v4665_v41, 0.0 }
0x11ca   :  { %2542 = vadd.xlane.f32.xlu1 %v2541_v42 }
0x11db   :  { %3122 = vrot.lane.b32.xlu1 %v5297_v49, %s4708_s30 }
0x11dc   :  { %2885 = vrot.lane.b32.xlu0 %v5302_v51, %s4708_s30 }
0x11e0   :  { %3043 = vrot.lane.b32.xlu0 %v5308_v30, %s4708_s30 }
0x11e4   :  { %v2534_v54 = vpop.xlane.xlu1 %2533 }
0x11e5   :  { %4666 = vrcp.f32 %v2534_v54 }
0x11e8   :  { %v2965_v57 = vpop.permute.xlu1 %2964 }
0x11ef   :  { %v4667_v55 = vpop.eup %4666 }
0x11f0   :  { %v2545_v56 = vmul.f32 %v4667_v55, %v4659_v60 }
0x11f2   :  { %4412 = vmatmul.mubr.msk.f32.vlgmr.msra.gmra.mrb[22].mxu1 %vm684_vm10, %v2545_v56 }
0x11f3   :  { %4420 = vmatpush3.msk.msra.mxu1 %vm178_vm3, %v2707_v48  ;;  %4421 = vmatprep.mubr.msk.f32.mxu1 %vm4703_vm0, %v4704_v4 }
0x11f4   :  { %4429 = vmatprep.subr.mxu1 %v4704_v4 }
0x124f   :  { %v2537_v53 = vpop.xlane.xlu0 %2536 }
0x1250   :  { %4668 = vrcp.f32 %v2537_v53 }
0x1253   :  { %v2540_v58 = vpop.xlane.xlu0 %2539 }
0x1254   :  { %4670 = vrcp.f32 %v2540_v58 }
0x1257   :  { %v2543_v59 = vpop.xlane.xlu1 %2542  ;;  %v2886_v0 = vpop.permute.xlu0 %2885 }
0x1258   :  { %4672 = vrcp.f32 %v2543_v59 }
0x125a   :  { %v4669_v25 = vpop.eup %4668 }
0x125b   :  { %v2547_v62 = vmul.f32 %v4669_v25, %v4661_v36  ;;  %v3044_v7 = vpop.permute.xlu0 %3043  ;;  %v3123_v28 = vpop.permute.xlu1 %3122 }
0x125d   :  { %4417 = vmatmul.mubr.msk.f32.vlgmr.msra.gmra.mrb[30].mxu0 %vm684_vm10, %v2547_v62 }
0x125e   :  { %v4671_v63 = vpop.eup %4670  ;;  %4425 = vmatpush3.msk.msra.mxu0 %vm178_vm3, %v2784_v33  ;;  %4426 = vmatprep.mubr.msk.f32.mxu0 %vm4703_vm0, %v4704_v4 }
0x125f   :  { %v2549_v43 = vmul.f32 %v4671_v63, %v4663_v39  ;;  %4434 = vmatprep.subr.mxu0 %v4704_v4 }
0x1261   :  { %4422 = vmatmul.mubr.msk.f32.vlgmr.msra.gmra.mrb[24].mxu1 %vm684_vm10, %v2549_v43 }
0x1262   :  { %v4673_v1 = vpop.eup %4672  ;;  %4430 = vmatpush3.xpose.msk.msra.mxu1 %vm330_vm7, %v2886_v0  ;;  %4431 = vmatprep.mubr.msk.f32.mxu1 %vm4703_vm0, %v4704_v4 }
0x1263   :  { %v2551_v3 = vmul.f32 %v4673_v1, %v4665_v41  ;;  %4439 = vmatprep.subr.mxu1 %v4704_v4 }
0x1265   :  { %4427 = vmatmul.mubr.msk.f32.vlgmr.msra.gmra.mrb[32].mxu0 %vm684_vm10, %v2551_v3  ;;  %4432 = vmatmul.mubr.msk.f32.vlgmr.msra.gmra.mrb[26].mxu1 %vm330_vm7, %v5302_v51 }
0x1266   :  { %4435 = vmatpush3.xpose.msk.msra.mxu0 %vm330_vm7, %v2965_v57  ;;  %4440 = vmatpush3.xpose.msk.msra.mxu1 %vm330_vm7, %v3044_v7 }
0x1267   :  { %4436 = vmatprep.mubr.msk.f32.mxu0 %vm4703_vm0, %v4704_v4  ;;  %4441 = vmatprep.mubr.msk.f32.mxu1 %vm4703_vm0, %v4704_v4 }
0x1268   :  { %4444 = vmatprep.subr.mxu0 %v4704_v4  ;;  %4449 = vmatprep.subr.mxu1 %v4704_v4 }
0x1269   :  { %4437 = vmatmul.mubr.msk.f32.vlgmr.msra.gmra.mrb[34].mxu0 %vm330_vm7, %v5284_v20  ;;  %4442 = vmatmul.mubr.msk.f32.vlgmr.msra.gmra.mrb[28].mxu1 %vm330_vm7, %v5308_v30 }
0x126a   :  { %4445 = vmatpush3.xpose.msk.msra.mxu0 %vm330_vm7, %v3123_v28  ;;  %4446 = vmatprep.mubr.msk.f32.mxu0 %vm4703_vm0, %v4704_v4  ;;  %v4070_v28 = vld [vmem:[%s5517_s10 + $0x20] sm:$0xff] }
0x126b   :  { %4454 = vmatprep.subr.mxu0 %v4704_v4  ;;  %4451 = vmatprep.mubr.msk.f32.mxu1 %vm4703_vm0, %v4704_v4 }
0x126d   :  { %4447 = vmatmul.mubr.msk.f32.vlgmr.msra.gmra.mrb[36].mxu0 %vm330_vm7, %v5297_v49 }
0x126e   :  { %4456 = vmatprep.mubr.msk.f32.mxu0 %vm4703_vm0, %v4704_v4 }
0x12c5   :  { %v5352_v5 = vpop.f32.mrb[22].mxu1 }
0x12c6   :  { %v4413_v31 = vpop.f32.mrb[23].mxu1 }
0x12c7   :  { %v4071_v31 = vld [vmem:[%s5517_s10 + $0x28] sm:$0xff] }
0x1330   :  { %v2702_v9 = vpop.f32.mrb[30].mxu0 }
0x1331   :  { %v4418_v10 = vpop.f32.mrb[31].mxu0 }
0x1332   :  { %v4072_v10 = vld [vmem:[%s5517_s10 + $0x30] sm:$0xff] }
0x1334   :  { %v5354_v11 = vpop.f32.mrb[24].mxu1 }
0x1335   :  { %v4423_v13 = vpop.f32.mrb[25].mxu1 }
0x1338   :  { %v5356_v14 = vpop.f32.mrb[32].mxu0  ;;  %v2957_v15 = vpop.f32.mrb[26].mxu1 }
0x1339   :  { %v3198_v16 = vmul.f32 0.35355338, %v2957_v15  ;;  %v4428_v17 = vpop.f32.mrb[33].mxu0  ;;  %v4433_v2 = vpop.f32.mrb[27].mxu1 }
0x133b   :  { %v3202_v6 = vsel %vm637_vm8, %v3198_v16, -inf }
0x133c   :  { %v3036_v60 = vpop.f32.mrb[34].mxu0  ;;  %3203 = vmax.xlane.f32.xlu0 %v3202_v6  ;;  %v3115_v18 = vpop.f32.mrb[28].mxu1 }
0x133d   :  { %v3199_v19 = vmul.f32 0.35355338, %v3036_v60  ;;  %v3200_v61 = vmul.f32 0.35355338, %v3115_v18  ;;  %v4438_v21 = vpop.f32.mrb[35].mxu0  ;;  %v4443_v22 = vpop.f32.mrb[29].mxu1 }
0x133f   :  { %v3205_v23 = vsel %vm637_vm8, %v3199_v19, -inf  ;;  %v3208_v24 = vsel %vm637_vm8, %v3200_v61, -inf }
0x1340   :  { %3206 = vmax.xlane.f32.xlu1 %v3205_v23  ;;  %v3194_v26 = vpop.f32.mrb[36].mxu0  ;;  %3209 = vmax.xlane.f32.xlu0 %v3208_v24 }
0x1341   :  { %v3201_v27 = vmul.f32 0.35355338, %v3194_v26  ;;  %v4448_v29 = vpop.f32.mrb[37].mxu0 }
0x1343   :  { %v3211_v32 = vsel %vm637_vm8, %v3201_v27, -inf }
0x1344   :  { %3212 = vmax.xlane.f32.xlu0 %v3211_v32 }
0x1351   :  { %3323 = vrot.lane.b32.xlu1 %v5284_v20, %s4709_s2 }
0x1355   :  { %3400 = vrot.lane.b32.xlu1 %v5308_v30, %s4709_s2 }
0x13c9   :  { %v3204_v34 = vpop.xlane.xlu0 %3203 }
0x13ca   :  { %v3214_v35 = vsub.f32 %v3198_v16, %v3204_v34 }
0x13cc   :  { %v3218_v36 = vmul.f32 1.442695, %v3214_v35 }
0x13cd   :  { %v3207_v37 = vpop.xlane.xlu1 %3206  ;;  %v3210_v38 = vpop.xlane.xlu0 %3209 }
0x13ce   :  { %4674 = vpow2.f32 %v3218_v36  ;;  %v3215_v39 = vsub.f32 %v3199_v19, %v3207_v37  ;;  %v3216_v40 = vsub.f32 %v3200_v61, %v3210_v38  ;;  %v4075_v37 = vld [vmem:[%s5518_s11 + $0x1] ss:$0 sm:$0xff] }
0x13d0   :  { %v3220_v41 = vmul.f32 1.442695, %v3215_v39  ;;  %v3222_v42 = vmul.f32 1.442695, %v3216_v40 }
0x13d1   :  { %v3324_v44 = vpop.permute.xlu1 %3323  ;;  %v3213_v45 = vpop.xlane.xlu0 %3212 }
0x13d2   :  { %4676 = vpow2.f32 %v3220_v41  ;;  %v3217_v46 = vsub.f32 %v3201_v27, %v3213_v45  ;;  %4455 = vmatpush3.msk.msra.mxu0 %vm178_vm3, %v3324_v44 }
0x13d3   :  { %4678 = vpow2.f32 %v3222_v42  ;;  %4464 = vmatprep.subr.mxu0 %v4704_v4 }
0x13d4   :  { %v3224_v20 = vmul.f32 1.442695, %v3217_v46 }
0x13d5   :  { %v3401_v56 = vpop.permute.xlu1 %3400 }
0x13d6   :  { %4680 = vpow2.f32 %v3224_v20 }
0x13d8   :  { %v4675_v47 = vpop.eup %4674 }
0x13d9   :  { %v3226_v48 = vsel %vm637_vm8, %v4675_v47, 0.0 }
0x13da   :  { %3227 = vadd.xlane.f32.xlu0 %v3226_v48 }
0x13dc   :  { %v4677_v50 = vpop.eup %4676 }
0x13dd   :  { %v4679_v52 = vpop.eup %4678  ;;  %v3229_v30 = vsel %vm637_vm8, %v4677_v50, 0.0 }
0x13de   :  { %3230 = vadd.xlane.f32.xlu1 %v3229_v30  ;;  %v3232_v33 = vsel %vm637_vm8, %v4679_v52, 0.0 }
0x13df   :  { %3233 = vadd.xlane.f32.xlu0 %v3232_v33 }
0x13e0   :  { %v4681_v54 = vpop.eup %4680 }
0x13e1   :  { %v3235_v55 = vsel %vm637_vm8, %v4681_v54, 0.0 }
0x13e2   :  { %3236 = vadd.xlane.f32.xlu1 %v3235_v55  ;;  %v4083_v55 = vld [vmem:[%s5519_s14 + $0x28] sm:$0xff] }
0x13f3   :  { %3477 = vrot.lane.b32.xlu1 %v5297_v49, %s4709_s2 }
0x13f5   :  { %3246 = vrot.lane.b32.xlu0 %v5302_v51, %s4709_s2 }
0x13f9   :  { %2861 = vrot.lane.b32.xlu0 %v2702_v9, %s4710_s21  ;;  %v4567_v9 = vpack.c.bf16 %v4071_v31, %v4070_v28 }
0x1467   :  { %v3228_v53 = vpop.xlane.xlu0 %3227 }
0x1468   :  { %4682 = vrcp.f32 %v3228_v53  ;;  %v4084_v53 = vld [vmem:[%s5519_s14 + $0x30] sm:$0xff] }
0x146b   :  { %v3231_v57 = vpop.xlane.xlu1 %3230 }
0x146c   :  { %4684 = vrcp.f32 %v3231_v57  ;;  %v3234_v58 = vpop.xlane.xlu0 %3233  ;;  %v4085_v57 = vld [vmem:[%s5519_s14 + $0x38] sm:$0xff] }
0x146d   :  { %4686 = vrcp.f32 %v3234_v58  ;;  %v4579_v58 = vpack.c.bf16 %v4085_v57, %v4084_v53 }
0x146f   :  { %v3237_v59 = vpop.xlane.xlu1 %3236 }
0x1470   :  { %4688 = vrcp.f32 %v3237_v59  ;;  %v3247_v25 = vpop.permute.xlu0 %3246 }
0x1471   :  { %4450 = vmatpush3.msk.msra.mxu1 %vm178_vm3, %v3247_v25 }
0x1472   :  { %v4683_v62 = vpop.eup %4682  ;;  %4459 = vmatprep.subr.mxu1 %v4704_v4 }
0x1473   :  { %v3239_v49 = vmul.f32 %v4683_v62, %v4675_v47  ;;  %v3478_v1 = vpop.permute.xlu1 %3477 }
0x1474   :  { %v2862_v61 = vpop.permute.xlu0 %2861 }
0x1475   :  { %4452 = vmatmul.mubr.msk.f32.vlgmr.msra.gmra.mrb[30].mxu1 %vm684_vm10, %v3239_v49 }
0x1476   :  { %v4685_v51 = vpop.eup %4684  ;;  %4460 = vmatpush3.msk.msra.mxu1 %vm178_vm3, %v3401_v56  ;;  %4461 = vmatprep.mubr.msk.f32.mxu1 %vm4703_vm0, %v4704_v4 }
0x1477   :  { %v4687_v63 = vpop.eup %4686  ;;  %v3241_v43 = vmul.f32 %v4685_v51, %v4677_v50  ;;  %4568 = vmatprep.subr.bf16.mxu1 %v4567_v9 }
0x1478   :  { %v3243_v0 = vmul.f32 %v4687_v63, %v4679_v52 }
0x1479   :  { %4457 = vmatmul.mubr.msk.f32.vlgmr.msra.gmra.mrb[38].mxu0 %vm684_vm10, %v3241_v43 }
0x147a   :  { %v4689_v3 = vpop.eup %4688  ;;  %4462 = vmatmul.mubr.msk.f32.vlgmr.msra.gmra.mrb[32].mxu1 %vm684_vm10, %v3243_v0  ;;  %4465 = vmatpush3.msk.msra.mxu0 %vm178_vm3, %v3478_v1  ;;  %v4080_v0 = vld [vmem:[%s5520_s12 + $0x1] ss:$0 sm:$0xff] }
0x147b   :  { %v3245_v7 = vmul.f32 %v4689_v3, %v4681_v54  ;;  %4466 = vmatprep.mubr.msk.f32.mxu0 %vm4703_vm0, %v4704_v4  ;;  %4570 = vmatpush3.bf16.msra.mxu1 %v4567_v9  ;;  %v4073_v4 = vld [vmem:[%s5517_s10 + $0x38] sm:$0xff]  ;;  %v4082_v54 = vld [vmem:[%s5519_s14 + $0x20] sm:$0xff] }
0x147c   :  { %v4571_v13 = vpack.c.bf16 %v4073_v4, %v4072_v10  ;;  %v4575_v56 = vpack.c.bf16 %v4083_v55, %v4082_v54  ;;  %v4081_v3 = vld [vmem:[%s5521_s13 + $0x1] ss:$0 sm:$0xff] }
0x147d   :  { %4467 = vmatmul.mubr.msk.f32.vlgmr.msra.gmra.mrb[40].mxu0 %vm684_vm10, %v3245_v7 }
0x147e   :  { %4572 = vmatprep.subr.bf16.mxu1 %v4571_v13  ;;  %4576 = vmatprep.subr.bf16.mxu0 %v4575_v56 }
0x147f   :  { %4574 = vmatpush3.bf16.msra.mxu1 %v4571_v13  ;;  %4578 = vmatpush3.bf16.msra.mxu0 %v4575_v56  ;;  %v4090_v13 = vld [vmem:[%s5522_s16 + $0x40] sm:$0xff] }
0x1480   :  { %4580 = vmatprep.subr.bf16.mxu0 %v4579_v58 }
0x1483   :  { %4582 = vmatpush3.bf16.msra.mxu0 %v4579_v58 }
0x1548   :  { %v3319_v15 = vpop.f32.mrb[30].mxu1 }
0x1549   :  { %v4453_v16 = vpop.f32.mrb[31].mxu1 }
0x154c   :  { %v3396_v17 = vpop.f32.mrb[38].mxu0 }
0x154d   :  { %v3473_v2 = vpop.f32.mrb[32].mxu1  ;;  %v4458_v6 = vpop.f32.mrb[39].mxu0  ;;  %3555 = vrot.lane.b32.xlu0 %v3396_v17, %s4710_s21  ;;  %v4092_v17 = vld [vmem:[%s5522_s16 + $0x50] sm:$0xff] }
0x154e   :  { %3559 = vrot.lane.b32.xlu1 %v3473_v2, %s4711_s27  ;;  %v4463_v60 = vpop.f32.mrb[33].mxu1  ;;  %v4093_v2 = vld [vmem:[%s5522_s16 + $0x58] sm:$0xff] }
0x154f   :  { %v4587_v6 = vpack.c.bf16 %v4093_v2, %v4092_v17  ;;  %v4094_v60 = vld [vmem:[%s5522_s16 + $0x60] sm:$0xff] }
0x1550   :  { %v3550_v18 = vpop.f32.mrb[40].mxu0 }
0x1551   :  { %2865 = vrot.lane.b32.xlu0 %v5354_v11, %s4711_s27  ;;  %v4468_v19 = vpop.f32.mrb[41].mxu0  ;;  %v2872_v11 = vsel %vm330_vm7, %v5352_v5, %v2862_v61  ;;  %v4096_v61 = vld [vmem:[%s5522_s16 + $0x70] sm:$0xff] }
0x1552   :  { %3563 = vrot.lane.b32.xlu1 %v3550_v18, %s4712_s28  ;;  %v4095_v18 = vld [vmem:[%s5522_s16 + $0x68] sm:$0xff] }
0x1553   :  { %v4591_v19 = vpack.c.bf16 %v4095_v18, %v4094_v60 }
0x1556   :  { %2869 = vrot.lane.b32.xlu1 %v5356_v14, %s4712_s28 }
0x15bf   :  { %v3556_v21 = vpop.permute.xlu0 %3555 }
0x15c0   :  { %v3560_v22 = vpop.permute.xlu1 %3559  ;;  %v3566_v23 = vsel %vm330_vm7, %v3319_v15, %v3556_v21  ;;  %v4091_v15 = vld [vmem:[%s5522_s16 + $0x48] sm:$0xff]  ;;  %v4097_v21 = vld [vmem:[%s5522_s16 + $0x78] sm:$0xff] }
0x15c1   :  { %v3567_v26 = vsel %vm1004_vm11, %v3566_v23, %v3560_v22  ;;  %v4583_v16 = vpack.c.bf16 %v4091_v15, %v4090_v13  ;;  %v4595_v22 = vpack.c.bf16 %v4097_v21, %v4096_v61  ;;  %v4087_v23 = vld [vmem:[%s5523_s15 + $0x1] ss:$0 sm:$0xff]  ;;  %v4103_v13 = vld [vmem:[%s5526_s19] ss:$0 sm:$0xff] }
0x15c3   :  { %v2866_v29 = vpop.permute.xlu0 %2865  ;;  %4584 = vmatprep.subr.bf16.mxu1 %v4583_v16 }
0x15c4   :  { %v3564_v24 = vpop.permute.xlu1 %3563  ;;  %v2873_v34 = vsel %vm1004_vm11, %v2872_v11, %v2866_v29 }
0x15c5   :  { %v3568_v27 = vsel %vm1006_vm12, %v3567_v26, %v3564_v24 }
0x15c6   :  { %v3570_v32 = vrot.slane %v3568_v27, 3 }
0x15c8   :  { %v2870_v35 = vpop.permute.xlu1 %2869 }
0x15c9   :  { %v2874_v14 = vsel %vm1006_vm12, %v2873_v34, %v2870_v35 }
0x15ca   :  { %v3572_v36 = vsel %vm178_vm3, %v2874_v14, %v3570_v32 }
0x15cb   :  { %4477 = vmatprep.mubr.msk.f32.mxu1 %vm184_vm5, %v3572_v36 }
0x15cc   :  { %4478 = vmatmul.mubr.msk.f32.vlgmr.msra.gmra.mrb[34].mxu1 %vm184_vm5, %v3570_v32 }
0x15cd   :  { %4586 = vmatpush3.bf16.msra.mxu1 %v4583_v16 }
0x15ce   :  { %4588 = vmatprep.subr.bf16.mxu1 %v4587_v6 }
0x15d1   :  { %4590 = vmatpush3.bf16.msra.mxu1 %v4587_v6 }
0x15d2   :  { %4592 = vmatprep.subr.bf16.mxu1 %v4591_v19 }
0x15d5   :  { %4594 = vmatpush3.bf16.msra.mxu1 %v4591_v19 }
0x15d6   :  { %4596 = vmatprep.subr.bf16.mxu1 %v4595_v22 }
0x15d9   :  { %4598 = vmatpush3.bf16.msra.mxu1 %v4595_v22 }
0x169f   :  { %v4479_v38 = vpop.f32.mrb[34].mxu1 }
0x16a0   :  { %v3663_v39 = vadd.f32 %v4479_v38, %v4075_v37  ;;  %v3657_v40 = vpop.f32.mrb[35].mxu1 }
0x16a1   :  { %v3658_v5 = vadd.f32 %v4075_v37, %v3657_v40 }
0x16a2   :  { %v5422_v41 = vadd.f32 %v3663_v39, %v5174_v12 }
0x16a3   :  { %v5425_v42 = vadd.f32 %v3658_v5, %v5177_v8 }
0x16a4   :  { %v3675_v44 = vsel %vm188_vm6, %v5422_v41, 0.0 }
0x16a5   :  { %3676 = vadd.xlane.f32.xlu1 %v3675_v44  ;;  %v3672_v45 = vsel %vm184_vm5, %v5425_v42, 0.0 }
0x16a6   :  { %3673 = vadd.xlane.f32.xlu0 %v3672_v45 }
0x1732   :  { %v3677_v46 = vpop.xlane.xlu1 %3676 }
0x1733   :  { %v3679_v20 = vmul.f32 0.03125, %v3677_v46  ;;  %v3674_v47 = vpop.xlane.xlu0 %3673 }
0x1734   :  { %v3678_v48 = vmul.f32 0.03125, %v3674_v47 }
0x1735   :  { %v3681_v50 = vsub.f32 %v5422_v41, %v3679_v20 }
0x1736   :  { %v3680_v12 = vsub.f32 %v5425_v42, %v3678_v48 }
0x1737   :  { %v3683_v30 = vmul.f32 %v3681_v50, %v3681_v50 }
0x1738   :  { %v3682_v52 = vmul.f32 %v3680_v12, %v3680_v12 }
0x1739   :  { %v3687_v33 = vsel %vm188_vm6, %v3683_v30, 0.0 }
0x173a   :  { %v3684_v8 = vsel %vm184_vm5, %v3682_v52, 0.0 }
0x173b   :  { %3685 = vadd.xlane.f32.xlu0 %v3684_v8 }
0x173f   :  { %3688 = vadd.xlane.f32.xlu0 %v3687_v33 }
0x17c8   :  { %v3686_v59 = vpop.xlane.xlu0 %3685 }
0x17c9   :  { %v3690_v25 = vmul.f32 0.03125, %v3686_v59 }
0x17cb   :  { %v3692_v62 = vadd.f32 1e-05, %v3690_v25 }
0x17cc   :  { %v3689_v49 = vpop.xlane.xlu0 %3688 }
0x17cd   :  { %4690 = vrsqrt.f32 %v3692_v62  ;;  %v3691_v51 = vmul.f32 0.03125, %v3689_v49 }
0x17cf   :  { %v3693_v63 = vadd.f32 1e-05, %v3691_v51 }
0x17d1   :  { %4692 = vrsqrt.f32 %v3693_v63 }
0x17d7   :  { %v4691_v43 = vpop.eup %4690 }
0x17d8   :  { %v3696_v1 = vmul.f32 %v4691_v43, %v3680_v12  ;;  %v4099_v12 = vld [vmem:[%s5524_s17 + $0x1] ss:$0 sm:$0xff] }
0x17da   :  { %v3704_v7 = vmul.f32 %v4080_v0, %v3696_v1 }
0x17db   :  { %v4693_v28 = vpop.eup %4692 }
0x17dc   :  { %v3697_v31 = vmul.f32 %v4693_v28, %v3681_v50  ;;  %v3712_v9 = vadd.f32 %v4081_v3, %v3704_v7 }
0x17de   :  { %v3705_v10 = vmul.f32 %v4080_v0, %v3697_v31  ;;  %4488 = vmatprep.mubr.msk.f32.mxu0 %vm184_vm5, %v3712_v9  ;;  %v4102_v9 = vld [vmem:[%s5525_s18] ss:$0 sm:$0xff] }
0x17e0   :  { %v3713_v4 = vadd.f32 %v4081_v3, %v3705_v10 }
0x17e2   :  { %4489 = vmatmul.mubr.msk.f32.vlgmr.msra.gmra.mrb[42].mxu0 %vm184_vm5, %v3713_v4 }
0x18b5   :  { %v4490_v24 = vpop.f32.mrb[42].mxu0 }
0x18b6   :  { %v3805_v26 = vadd.f32 %v4490_v24, %v4087_v23  ;;  %v3799_v27 = vpop.f32.mrb[43].mxu0 }
0x18b7   :  { %v3800_v29 = vadd.f32 %v4087_v23, %v3799_v27 }
0x18b8   :  { %v3809_v11 = vmul.f32 %v3805_v26, %v3805_v26 }
0x18b9   :  { %v3808_v32 = vmul.f32 %v3800_v29, %v3800_v29 }
0x18ba   :  { %v3811_v34 = vmul.f32 %v3809_v11, %v3805_v26 }
0x18bb   :  { %v3810_v35 = vmul.f32 %v3808_v32, %v3800_v29 }
0x18bc   :  { %v3813_v14 = vmul.f32 0.044715, %v3811_v34 }
0x18bd   :  { %v3812_v36 = vmul.f32 0.044715, %v3810_v35 }
0x18be   :  { %v3815_v37 = vadd.f32 %v3813_v14, %v3805_v26 }
0x18bf   :  { %v3814_v38 = vadd.f32 %v3812_v36, %v3800_v29 }
0x18c0   :  { %v3817_v39 = vmul.f32 0.7978846, %v3815_v37 }
0x18c1   :  { %v3816_v40 = vmul.f32 0.7978846, %v3814_v38 }
0x18c2   :  { %4694 = vtanh.f32 %v3817_v39 }
0x18c3   :  { %4696 = vtanh.f32 %v3816_v40 }
0x18cc   :  { %v4695_v5 = vpop.eup %4694 }
0x18cd   :  { %v4697_v44 = vpop.eup %4696  ;;  %v3821_v45 = vadd.f32 1.0, %v4695_v5 }
0x18ce   :  { %v3820_v46 = vadd.f32 1.0, %v4697_v44 }
0x18cf   :  { %v3823_v20 = vmul.f32 0.5, %v3821_v45 }
0x18d0   :  { %v3822_v47 = vmul.f32 0.5, %v3820_v46 }
0x18d1   :  { %v3825_v50 = vmul.f32 %v3823_v20, %v3805_v26 }
0x18d2   :  { %v3824_v48 = vmul.f32 %v3822_v47, %v3800_v29 }
0x18d4   :  { %4507 = vmatprep.mubr.msk.f32.mxu1 %vm1969_vm13, %v3824_v48 }
0x18d5   :  { %4508 = vmatmul.mubr.msk.f32.vlgmr.msra.gmra.mrb[36].mxu1 %vm1969_vm13, %v3825_v50 }
0x19a8   :  { %v4509_v52 = vpop.f32.mrb[36].mxu1 }
0x19a9   :  { %v3921_v8 = vadd.f32 %v4509_v52, %v4099_v12  ;;  %v3915_v30 = vpop.f32.mrb[37].mxu1 }
0x19aa   :  { %v3916_v33 = vadd.f32 %v4099_v12, %v3915_v30 }
0x19ab   :  { %v3925_v54 = vadd.f32 %v3921_v8, %v5422_v41 }
0x19ac   :  { %v3924_v55 = vadd.f32 %v3916_v33, %v5425_v42 }
0x19ad   :  { %v3931_v56 = vsel %vm188_vm6, %v3925_v54, 0.0 }
0x19ae   :  { %3932 = vadd.xlane.f32.xlu1 %v3931_v56  ;;  %v3928_v53 = vsel %vm184_vm5, %v3924_v55, 0.0 }
0x19af   :  { %3929 = vadd.xlane.f32.xlu0 %v3928_v53 }
0x1a3b   :  { %v3933_v57 = vpop.xlane.xlu1 %3932 }
0x1a3c   :  { %v3935_v58 = vmul.f32 0.03125, %v3933_v57  ;;  %v3930_v59 = vpop.xlane.xlu0 %3929 }
0x1a3d   :  { %v3934_v25 = vmul.f32 0.03125, %v3930_v59 }
0x1a3e   :  { %v3937_v62 = vsub.f32 %v3925_v54, %v3935_v58 }
0x1a3f   :  { %v3936_v49 = vsub.f32 %v3924_v55, %v3934_v25 }
0x1a40   :  { %v3939_v51 = vmul.f32 %v3937_v62, %v3937_v62 }
0x1a41   :  { %v3938_v63 = vmul.f32 %v3936_v49, %v3936_v49 }
0x1a42   :  { %v3943_v43 = vsel %vm188_vm6, %v3939_v51, 0.0 }
0x1a43   :  { %3944 = vadd.xlane.f32.xlu1 %v3943_v43  ;;  %v3940_v41 = vsel %vm184_vm5, %v3938_v63, 0.0 }
0x1a44   :  { %3941 = vadd.xlane.f32.xlu0 %v3940_v41 }
0x1ad0   :  { %v3945_v42 = vpop.xlane.xlu1 %3944 }
0x1ad1   :  { %v3947_v0 = vmul.f32 0.03125, %v3945_v42  ;;  %v3942_v1 = vpop.xlane.xlu0 %3941 }
0x1ad2   :  { %v3946_v3 = vmul.f32 0.03125, %v3942_v1 }
0x1ad3   :  { %v3949_v7 = vadd.f32 1e-05, %v3947_v0 }
0x1ad4   :  { %v3948_v28 = vadd.f32 1e-05, %v3946_v3 }
0x1ad5   :  { %4698 = vrsqrt.f32 %v3949_v7 }
0x1ad6   :  { %4700 = vrsqrt.f32 %v3948_v28 }
0x1adf   :  { %v4699_v31 = vpop.eup %4698 }
0x1ae0   :  { %v4701_v10 = vpop.eup %4700  ;;  %v3953_v4 = vmul.f32 %v4699_v31, %v3937_v62 }
0x1ae1   :  { %v3952_v15 = vmul.f32 %v4701_v10, %v3936_v49 }
0x1ae2   :  { %v3961_v16 = vmul.f32 %v4102_v9, %v3953_v4 }
0x1ae3   :  { %v3960_v17 = vmul.f32 %v4102_v9, %v3952_v15 }
0x1ae4   :  { %v3969_v2 = vadd.f32 %v4103_v13, %v3961_v16 }
0x1ae5   :  { %v3968_v6 = vadd.f32 %v4103_v13, %v3960_v17 }
0x1ae6   :  { %3971 = vst.msk [vmem:[%s5527_s20 + $0x8] sm:$0x3] %vm188_vm6, %v3969_v2 }
0x1ae7   :  { %3970 = vst.msk [vmem:[%s5527_s20] sm:$0xff] %vm184_vm5, %v3968_v6 }

</bundles_post_ra>
